<compile_context>
chip_gen: v7x
topology: tpu7x:2x2x1
jax: 0.10.0
libtpu: 0.0.40
codegen_flags: <defaults>
</compile_context>

<pallas_src>
import functools
import math

import jax
import jax.numpy as jnp
from jax.experimental import pallas as pl
from jax.experimental.pallas import tpu as pltpu

# ---------------- small synthetic BERT config ----------------
VOCAB = 100
HIDDEN = 32
LAYERS = 2
HEADS = 2
HEAD_DIM = HIDDEN // HEADS
INTER = 64
MAX_POS = 64
TYPE_VOCAB = 2
LN_EPS = 1e-12

BATCH = 2
SEQ = 8

# packed-QKV layout: [ Q (H) | K (H) | V (H) | zero pad ] -> one 128-lane tile
QKV_COLS = 128
assert 3 * HIDDEN <= QKV_COLS

OUT_LANE = 128          # lane-dense logits slab (full 128-lane unmasked store)


# ---------------- parameter packing (run once at init) ----------------
def _pack_qkv(qw, kw, vw, qb, kb, vb):
    """(H,H)/(H,) q/k/v -> single (H,128)/(1,128) tile; Q pre-scaled by 1/sqrt(D)."""
    scale = 1.0 / math.sqrt(HEAD_DIM)
    w = jnp.concatenate([qw * scale, kw, vw], axis=1)               # (H, 3H)
    w = jnp.pad(w, ((0, 0), (0, QKV_COLS - 3 * HIDDEN)))            # (H, 128)
    b = jnp.concatenate([qb * scale, kb, vb])[None, :]               # (1, 3H)
    b = jnp.pad(b, ((0, 0), (0, QKV_COLS - 3 * HIDDEN)))             # (1, 128)
    return w, b


# ---------------- in-kernel helpers ----------------
def _layer_norm(x, gamma, beta):
    mu = jnp.mean(x, axis=-1, keepdims=True)
    xc = x - mu
    var = jnp.mean(xc * xc, axis=-1, keepdims=True)
    return xc * jax.lax.rsqrt(var + LN_EPS) * gamma + beta


def _attention(qkv_b, mask_b, q_rows):
    """Multi-head attention for one batch element.
    qkv_b: (S, QKV_COLS) packed [Q|K|V]; mask_b: (1, S) additive mask;
    q_rows: number of query rows (S normally, 1 in the CLS-only last layer)."""
    heads = []
    for hd in range(HEADS):
        q = qkv_b[:q_rows, hd * HEAD_DIM:(hd + 1) * HEAD_DIM]
        k = qkv_b[:, HIDDEN + hd * HEAD_DIM: HIDDEN + (hd + 1) * HEAD_DIM]
        v = qkv_b[:, 2 * HIDDEN + hd * HEAD_DIM: 2 * HIDDEN + (hd + 1) * HEAD_DIM]
        # contract last dims directly (Q already carries the 1/sqrt(D) scale)
        s = jax.lax.dot_general(q, k, (((1,), (1,)), ((), ())),
                                preferred_element_type=jnp.float32) + mask_b
        s = s - jnp.max(s, axis=-1, keepdims=True)
        p = jnp.exp(s)
        p = p * pl.reciprocal(jnp.sum(p, axis=-1, keepdims=True), approx=True)
        heads.append(jnp.dot(p, v, preferred_element_type=jnp.float32))     # (q_rows, D)
    return jnp.concatenate(heads, axis=1)                                    # (q_rows, H)


# ---------------- fused kernel: one call = whole batch, whole forward ----------------
def _bert_fused_kernel(ids_ref, typ_ref, mask_ref,
                       wemb_ref, pemb_ref, temb_ref, eg_ref, eb_ref,
                       qkvw_ref, qkvb_ref, aow_ref, aob_ref,
                       ln1g_ref, ln1b_ref, iw_ref, ib_ref,
                       ow_ref, ob_ref, ln2g_ref, ln2b_ref,
                       poolw_ref, poolb_ref, clsw_ref, clsb_ref,
                       out_ref, *, batch, seq, out_rows):
    inv_sqrt2 = 1.0 / math.sqrt(2.0)
    bs = batch * seq
    vocab = wemb_ref.shape[0]
    tvocab = temb_ref.shape[0]

    # ---- embeddings: exact one-hot MXU gathers (no XLA gather, no HBM round-trip) ----
    word_oh = (ids_ref[...] ==
               jax.lax.broadcasted_iota(jnp.int32, (bs, vocab), 1)).astype(jnp.float32)
    x = jnp.dot(word_oh, wemb_ref[...], preferred_element_type=jnp.float32)     # (bs, H)
    type_oh = (typ_ref[...] ==
               jax.lax.broadcasted_iota(jnp.int32, (bs, tvocab), 1)).astype(jnp.float32)
    x = x + jnp.dot(type_oh, temb_ref[...], preferred_element_type=jnp.float32)
    pos = pemb_ref[0:seq, :]                                                     # (S, H)
    x = x + jnp.concatenate([pos] * batch, axis=0)

    # HF-BERT additive attention mask built in-kernel: (1 - m) * -10000, shape (B, S)
    addm = (1.0 - mask_ref[...]) * (-10000.0)

    h = _layer_norm(x, eg_ref[...], eb_ref[...])                                 # (bs, H)

    for l in range(LAYERS):                                   # unrolled (LAYERS = 2)
        last = (l == LAYERS - 1)
        q_rows = 1 if last else seq          # last layer: only the CLS row feeds the pooler

        # fused QKV projection for all token rows (K/V always need every row)
        qkv = jnp.dot(h, qkvw_ref[l], preferred_element_type=jnp.float32) + qkvb_ref[l]

        ctx = jnp.concatenate(
            [_attention(qkv[b * seq:(b + 1) * seq, :], addm[b:b + 1, :], q_rows)
             for b in range(batch)], axis=0)                   # (batch*q_rows, H)

        if last:
            resid = jnp.concatenate(
                [h[b * seq:b * seq + 1, :] for b in range(batch)], axis=0)   # (batch, H)
        else:
            resid = h

        # single attention-output projection (dropout = identity at inference)
        attn = jnp.dot(ctx, aow_ref[l], preferred_element_type=jnp.float32) + aob_ref[l]
        y = _layer_norm(attn + resid, ln1g_ref[l], ln1b_ref[l])

        # feed-forward (exact erf-GELU) + residual + LayerNorm
        inter = jnp.dot(y, iw_ref[l], preferred_element_type=jnp.float32) + ib_ref[l]
        inter = 0.5 * inter * (1.0 + jax.lax.erf(inter * inv_sqrt2))
        ff = jnp.dot(inter, ow_ref[l], preferred_element_type=jnp.float32) + ob_ref[l]
        h = _layer_norm(ff + y, ln2g_ref[l], ln2b_ref[l])

    # ---- pooler (tanh on CLS hidden states, h is (batch, H)) + regression head ----
    pooled = jnp.tanh(jnp.dot(h, poolw_ref[...], preferred_element_type=jnp.float32)
                      + poolb_ref[...])
    logit = jnp.sum(pooled * clsw_ref[...], axis=-1, keepdims=True) + clsb_ref[...]  # (B,1)

    # lane/sublane-dense store: full (out_rows, 128) tile, wrapper slices [:B, :1]
    slab = jnp.broadcast_to(logit, (batch, OUT_LANE))
    pad = out_rows - batch
    if pad:
        slab = jnp.concatenate(
            [slab, jnp.zeros((pad, OUT_LANE), jnp.float32)], axis=0)
    out_ref[...] = slab


# ---------------- wrapper ----------------
_PARAM_ORDER = ("word_emb", "pos_emb", "type_emb", "emb_ln_g", "emb_ln_b",
                "qkv_w", "qkv_b", "ao_w", "ao_b",
                "ln1_g", "ln1_b", "i_w", "i_b", "o_w", "o_b", "ln2_g", "ln2_b",
                "pool_w", "pool_b", "cls_w", "cls_b")


@jax.jit
def bert_regression_forward(params, input_ids, attention_mask, token_type_ids=None):
    B, S = input_ids.shape
    if token_type_ids is None:
        token_type_ids = jnp.zeros((B, S), jnp.int32)

    ids_col = input_ids.reshape(B * S, 1).astype(jnp.int32)
    typ_col = token_type_ids.reshape(B * S, 1).astype(jnp.int32)
    mask_f = attention_mask.reshape(B, S).astype(jnp.float32)

    weights = [params[k] for k in _PARAM_ORDER]
    out_rows = ((B + 7) // 8) * 8                      # sublane-dense output slab

    kernel = functools.partial(_bert_fused_kernel, batch=B, seq=S, out_rows=out_rows)
    vmem = pl.BlockSpec(memory_space=pltpu.MemorySpace.VMEM)
    out = pl.pallas_call(
        kernel,
        out_shape=jax.ShapeDtypeStruct((out_rows, OUT_LANE), jnp.float32),
        in_specs=[vmem] * (3 + len(weights)),
        out_specs=vmem,
    )(ids_col, typ_col, mask_f, *weights)

    return out[:B, :1]                                  # (B, 1) logits


# ---------------- deterministic parameter init ----------------
def init_params(key):
    keys = iter(jax.random.split(key, 32))

    def nrm(shape):
        return jax.random.normal(next(keys), shape, jnp.float32) * 0.02

    p = {
        "word_emb": nrm((VOCAB, HIDDEN)),
        "pos_emb": nrm((MAX_POS, HIDDEN)),
        "type_emb": nrm((TYPE_VOCAB, HIDDEN)),
        "emb_ln_g": jnp.ones((1, HIDDEN), jnp.float32),
        "emb_ln_b": jnp.zeros((1, HIDDEN), jnp.float32),
    }

    qkv_w, qkv_b, ao_w, ao_b = [], [], [], []
    ln1_g, ln1_b, i_w, i_b, o_w, o_b, ln2_g, ln2_b = ([] for _ in range(8))
    for _ in range(LAYERS):
        qw, kw, vw = nrm((HIDDEN, HIDDEN)), nrm((HIDDEN, HIDDEN)), nrm((HIDDEN, HIDDEN))
        qb = jnp.zeros((HIDDEN,), jnp.float32)
        kb = jnp.zeros((HIDDEN,), jnp.float32)
        vb = jnp.zeros((HIDDEN,), jnp.float32)
        w, b = _pack_qkv(qw, kw, vw, qb, kb, vb)      # scale folded into Q at init
        qkv_w.append(w)                                # (H, 128)
        qkv_b.append(b)                                # (1, 128)

        ao_w.append(nrm((HIDDEN, HIDDEN)))             # unsplit: one projection matmul
        ao_b.append(jnp.zeros((1, HIDDEN), jnp.float32))

        ln1_g.append(jnp.ones((1, HIDDEN), jnp.float32))
        ln1_b.append(jnp.zeros((1, HIDDEN), jnp.float32))
        i_w.append(nrm((HIDDEN, INTER)))
        i_b.append(jnp.zeros((1, INTER), jnp.float32))
        o_w.append(nrm((INTER, HIDDEN)))
        o_b.append(jnp.zeros((1, HIDDEN), jnp.float32))
        ln2_g.append(jnp.ones((1, HIDDEN), jnp.float32))
        ln2_b.append(jnp.zeros((1, HIDDEN), jnp.float32))

    p["qkv_w"] = jnp.stack(qkv_w)      # (L, H, 128)
    p["qkv_b"] = jnp.stack(qkv_b)      # (L, 1, 128)
    p["ao_w"] = jnp.stack(ao_w)        # (L, H, H)
    p["ao_b"] = jnp.stack(ao_b)        # (L, 1, H)
    p["ln1_g"] = jnp.stack(ln1_g)
    p["ln1_b"] = jnp.stack(ln1_b)
    p["i_w"] = jnp.stack(i_w)          # (L, H, INTER)
    p["i_b"] = jnp.stack(i_b)          # (L, 1, INTER)
    p["o_w"] = jnp.stack(o_w)          # (L, INTER, H)
    p["o_b"] = jnp.stack(o_b)          # (L, 1, H)
    p["ln2_g"] = jnp.stack(ln2_g)
    p["ln2_b"] = jnp.stack(ln2_b)

    p["pool_w"] = nrm((HIDDEN, HIDDEN))
    p["pool_b"] = jnp.zeros((1, HIDDEN), jnp.float32)
    p["cls_w"] = nrm((1, HIDDEN))      # regression head weight as a row vector
    p["cls_b"] = jnp.zeros((1, 1), jnp.float32)
    return p


if __name__ == "__main__":
    key = jax.random.PRNGKey(0)
    pkey, ikey = jax.random.split(key)
    params = init_params(pkey)

    input_ids = jax.random.randint(ikey, (BATCH, SEQ), 0, VOCAB, dtype=jnp.int32)
    attention_mask = jnp.array(
        [[1, 1, 1, 1, 1, 1, 1, 1],
         [1, 1, 1, 1, 1, 0, 0, 0]], dtype=jnp.int32)

    logits = bert_regression_forward(params, input_ids, attention_mask)
    logits = jax.block_until_ready(logits)
    assert logits.shape == (BATCH, 1)
    assert bool(jnp.all(jnp.isfinite(logits)))
    print("KERNEL_OK")
</pallas_src>

<mosaic_0001>
module attributes {stable_mosaic.version = 11 : i64} {
  func.func @_bert_fused_kernel(%arg0: memref<16x1xi32, #tpu.memory_space<vmem>>, %arg1: memref<16x1xi32, #tpu.memory_space<vmem>>, %arg2: memref<2x8xf32, #tpu.memory_space<vmem>>, %arg3: memref<100x32xf32, #tpu.memory_space<vmem>>, %arg4: memref<64x32xf32, #tpu.memory_space<vmem>>, %arg5: memref<2x32xf32, #tpu.memory_space<vmem>>, %arg6: memref<1x32xf32, #tpu.memory_space<vmem>>, %arg7: memref<1x32xf32, #tpu.memory_space<vmem>>, %arg8: memref<2x32x128xf32, #tpu.memory_space<vmem>>, %arg9: memref<2x1x128xf32, #tpu.memory_space<vmem>>, %arg10: memref<2x32x32xf32, #tpu.memory_space<vmem>>, %arg11: memref<2x1x32xf32, #tpu.memory_space<vmem>>, %arg12: memref<2x1x32xf32, #tpu.memory_space<vmem>>, %arg13: memref<2x1x32xf32, #tpu.memory_space<vmem>>, %arg14: memref<2x32x64xf32, #tpu.memory_space<vmem>>, %arg15: memref<2x1x64xf32, #tpu.memory_space<vmem>>, %arg16: memref<2x64x32xf32, #tpu.memory_space<vmem>>, %arg17: memref<2x1x32xf32, #tpu.memory_space<vmem>>, %arg18: memref<2x1x32xf32, #tpu.memory_space<vmem>>, %arg19: memref<2x1x32xf32, #tpu.memory_space<vmem>>, %arg20: memref<32x32xf32, #tpu.memory_space<vmem>>, %arg21: memref<1x32xf32, #tpu.memory_space<vmem>>, %arg22: memref<1x32xf32, #tpu.memory_space<vmem>>, %arg23: memref<1x1xf32, #tpu.memory_space<vmem>>, %arg24: memref<8x128xf32, #tpu.memory_space<vmem>>) attributes {dimension_semantics = [], scalar_prefetch = 0 : i64, scratch_operands = 0 : i64, tpu.core_type = #tpu.core_type<tc>} {
    %c0 = arith.constant 0 : index
    %c0_0 = arith.constant 0 : index
    %0 = vector.load %arg0[%c0, %c0_0] : memref<16x1xi32, #tpu.memory_space<vmem>>, vector<16x1xi32>
    %1 = tpu.iota {dimensions = array<i32: 1>} : vector<16x100xi32>
    %2 = vector.broadcast %0 : vector<16x1xi32> to vector<16x100xi32>
    %3 = arith.cmpi eq, %2, %1 : vector<16x100xi32>
    %4 = arith.extui %3 : vector<16x100xi1> to vector<16x100xi32>
    %5 = arith.sitofp %4 : vector<16x100xi32> to vector<16x100xf32>
    %c0_1 = arith.constant 0 : index
    %c0_2 = arith.constant 0 : index
    %6 = vector.load %arg3[%c0_1, %c0_2] : memref<100x32xf32, #tpu.memory_space<vmem>>, vector<100x32xf32>
    %cst = arith.constant dense<0.000000e+00> : vector<16x32xf32>
    %7 = tpu.matmul %5, %6, %cst {dimension_numbers = #tpu.dot_dimension_numbers<[1], [0], [0], [1], [0, 0, 1, 1], [], []>} : vector<16x100xf32>, vector<100x32xf32>, vector<16x32xf32> -> vector<16x32xf32>
    %c0_3 = arith.constant 0 : index
    %c0_4 = arith.constant 0 : index
    %8 = vector.load %arg1[%c0_3, %c0_4] : memref<16x1xi32, #tpu.memory_space<vmem>>, vector<16x1xi32>
    %9 = tpu.iota {dimensions = array<i32: 1>} : vector<16x2xi32>
    %10 = vector.broadcast %8 : vector<16x1xi32> to vector<16x2xi32>
    %11 = arith.cmpi eq, %10, %9 : vector<16x2xi32>
    %12 = arith.extui %11 : vector<16x2xi1> to vector<16x2xi32>
    %13 = arith.sitofp %12 : vector<16x2xi32> to vector<16x2xf32>
    %c0_5 = arith.constant 0 : index
    %c0_6 = arith.constant 0 : index
    %14 = vector.load %arg5[%c0_5, %c0_6] : memref<2x32xf32, #tpu.memory_space<vmem>>, vector<2x32xf32>
    %cst_7 = arith.constant dense<0.000000e+00> : vector<16x32xf32>
    %15 = tpu.matmul %13, %14, %cst_7 {dimension_numbers = #tpu.dot_dimension_numbers<[1], [0], [0], [1], [0, 0, 1, 1], [], []>} : vector<16x2xf32>, vector<2x32xf32>, vector<16x32xf32> -> vector<16x32xf32>
    %16 = arith.addf %7, %15 : vector<16x32xf32>
    %c0_8 = arith.constant 0 : index
    %c0_9 = arith.constant 0 : index
    %17 = vector.load %arg4[%c0_8, %c0_9] : memref<64x32xf32, #tpu.memory_space<vmem>>, vector<8x32xf32>
    %18 = tpu.concatenate %17, %17 in 0 : vector<8x32xf32>, vector<8x32xf32> -> vector<16x32xf32>
    %19 = arith.addf %16, %18 : vector<16x32xf32>
    %c0_10 = arith.constant 0 : index
    %c0_11 = arith.constant 0 : index
    %20 = vector.load %arg2[%c0_10, %c0_11] : memref<2x8xf32, #tpu.memory_space<vmem>>, vector<2x8xf32>
    %cst_12 = arith.constant 1.000000e+00 : f32
    %21 = vector.broadcast %cst_12 : f32 to vector<2x8xf32>
    %22 = arith.subf %21, %20 : vector<2x8xf32>
    %cst_13 = arith.constant -1.000000e+04 : f32
    %23 = vector.broadcast %cst_13 : f32 to vector<2x8xf32>
    %24 = arith.mulf %22, %23 : vector<2x8xf32>
    %c0_14 = arith.constant 0 : index
    %c0_15 = arith.constant 0 : index
    %25 = vector.load %arg6[%c0_14, %c0_15] : memref<1x32xf32, #tpu.memory_space<vmem>>, vector<1x32xf32>
    %c0_16 = arith.constant 0 : index
    %c0_17 = arith.constant 0 : index
    %26 = vector.load %arg7[%c0_16, %c0_17] : memref<1x32xf32, #tpu.memory_space<vmem>>, vector<1x32xf32>
    %cst_18 = arith.constant dense<0.000000e+00> : vector<16xf32>
    %27 = vector.multi_reduction <add>, %19, %cst_18 [1] : vector<16x32xf32> to vector<16xf32>
    %28 = vector.shape_cast %27 : vector<16xf32> to vector<16x1xf32>
    %cst_19 = arith.constant 3.200000e+01 : f32
    %29 = vector.broadcast %cst_19 : f32 to vector<16x1xf32>
    %30 = arith.divf %28, %29 : vector<16x1xf32>
    %31 = vector.broadcast %30 : vector<16x1xf32> to vector<16x32xf32>
    %32 = arith.subf %19, %31 : vector<16x32xf32>
    %33 = arith.mulf %32, %32 : vector<16x32xf32>
    %cst_20 = arith.constant dense<0.000000e+00> : vector<16xf32>
    %34 = vector.multi_reduction <add>, %33, %cst_20 [1] : vector<16x32xf32> to vector<16xf32>
    %35 = vector.shape_cast %34 : vector<16xf32> to vector<16x1xf32>
    %cst_21 = arith.constant 3.200000e+01 : f32
    %36 = vector.broadcast %cst_21 : f32 to vector<16x1xf32>
    %37 = arith.divf %35, %36 : vector<16x1xf32>
    %cst_22 = arith.constant 9.99999996E-13 : f32
    %38 = vector.broadcast %cst_22 : f32 to vector<16x1xf32>
    %39 = arith.addf %37, %38 : vector<16x1xf32>
    %40 = math.rsqrt %39 : vector<16x1xf32>
    %41 = vector.broadcast %40 : vector<16x1xf32> to vector<16x32xf32>
    %42 = arith.mulf %32, %41 : vector<16x32xf32>
    %43 = vector.broadcast %25 : vector<1x32xf32> to vector<16x32xf32>
    %44 = arith.mulf %42, %43 : vector<16x32xf32>
    %45 = vector.broadcast %26 : vector<1x32xf32> to vector<16x32xf32>
    %46 = arith.addf %44, %45 : vector<16x32xf32>
    %c0_23 = arith.constant 0 : index
    %c0_24 = arith.constant 0 : index
    %c0_25 = arith.constant 0 : index
    %47 = vector.load %arg8[%c0_23, %c0_24, %c0_25] : memref<2x32x128xf32, #tpu.memory_space<vmem>>, vector<1x32x128xf32>
    %48 = vector.shape_cast %47 : vector<1x32x128xf32> to vector<32x128xf32>
    %cst_26 = arith.constant dense<0.000000e+00> : vector<16x128xf32>
    %49 = tpu.matmul %46, %48, %cst_26 {dimension_numbers = #tpu.dot_dimension_numbers<[1], [0], [0], [1], [0, 0, 1, 1], [], []>} : vector<16x32xf32>, vector<32x128xf32>, vector<16x128xf32> -> vector<16x128xf32>
    %c0_27 = arith.constant 0 : index
    %c0_28 = arith.constant 0 : index
    %c0_29 = arith.constant 0 : index
    %50 = vector.load %arg9[%c0_27, %c0_28, %c0_29] : memref<2x1x128xf32, #tpu.memory_space<vmem>>, vector<1x1x128xf32>
    %51 = vector.shape_cast %50 : vector<1x1x128xf32> to vector<1x128xf32>
    %52 = vector.broadcast %51 : vector<1x128xf32> to vector<16x128xf32>
    %53 = arith.addf %49, %52 : vector<16x128xf32>
    %54 = vector.extract_strided_slice %53 {offsets = [0, 0], sizes = [8, 128], strides = [1, 1]} : vector<16x128xf32> to vector<8x128xf32>
    %55 = vector.extract_strided_slice %24 {offsets = [0, 0], sizes = [1, 8], strides = [1, 1]} : vector<2x8xf32> to vector<1x8xf32>
    %56 = vector.extract_strided_slice %54 {offsets = [0, 0], sizes = [8, 16], strides = [1, 1]} : vector<8x128xf32> to vector<8x16xf32>
    %57 = vector.extract_strided_slice %54 {offsets = [0, 32], sizes = [8, 16], strides = [1, 1]} : vector<8x128xf32> to vector<8x16xf32>
    %58 = vector.extract_strided_slice %54 {offsets = [0, 64], sizes = [8, 16], strides = [1, 1]} : vector<8x128xf32> to vector<8x16xf32>
    %cst_30 = arith.constant dense<0.000000e+00> : vector<8x8xf32>
    %59 = tpu.matmul %56, %57, %cst_30 {dimension_numbers = #tpu.dot_dimension_numbers<[1], [1], [0], [0], [0, 0, 1, 0], [], []>} : vector<8x16xf32>, vector<8x16xf32>, vector<8x8xf32> -> vector<8x8xf32>
    %60 = vector.broadcast %55 : vector<1x8xf32> to vector<8x8xf32>
    %61 = arith.addf %59, %60 : vector<8x8xf32>
    %cst_31 = arith.constant dense<0xFF800000> : vector<8xf32>
    %62 = vector.multi_reduction <maximumf>, %61, %cst_31 [1] : vector<8x8xf32> to vector<8xf32>
    %63 = vector.shape_cast %62 : vector<8xf32> to vector<8x1xf32>
    %64 = vector.broadcast %63 : vector<8x1xf32> to vector<8x8xf32>
    %65 = arith.subf %61, %64 : vector<8x8xf32>
    %66 = math.exp %65 : vector<8x8xf32>
    %cst_32 = arith.constant dense<0.000000e+00> : vector<8xf32>
    %67 = vector.multi_reduction <add>, %66, %cst_32 [1] : vector<8x8xf32> to vector<8xf32>
    %68 = vector.shape_cast %67 : vector<8xf32> to vector<8x1xf32>
    %69 = tpu.reciprocal %68 {approx = true} : vector<8x1xf32> -> vector<8x1xf32>
    %70 = vector.broadcast %69 : vector<8x1xf32> to vector<8x8xf32>
    %71 = arith.mulf %66, %70 : vector<8x8xf32>
    %cst_33 = arith.constant dense<0.000000e+00> : vector<8x16xf32>
    %72 = tpu.matmul %71, %58, %cst_33 {dimension_numbers = #tpu.dot_dimension_numbers<[1], [0], [0], [1], [0, 0, 1, 1], [], []>} : vector<8x8xf32>, vector<8x16xf32>, vector<8x16xf32> -> vector<8x16xf32>
    %73 = vector.extract_strided_slice %54 {offsets = [0, 16], sizes = [8, 16], strides = [1, 1]} : vector<8x128xf32> to vector<8x16xf32>
    %74 = vector.extract_strided_slice %54 {offsets = [0, 48], sizes = [8, 16], strides = [1, 1]} : vector<8x128xf32> to vector<8x16xf32>
    %75 = vector.extract_strided_slice %54 {offsets = [0, 80], sizes = [8, 16], strides = [1, 1]} : vector<8x128xf32> to vector<8x16xf32>
    %cst_34 = arith.constant dense<0.000000e+00> : vector<8x8xf32>
    %76 = tpu.matmul %73, %74, %cst_34 {dimension_numbers = #tpu.dot_dimension_numbers<[1], [1], [0], [0], [0, 0, 1, 0], [], []>} : vector<8x16xf32>, vector<8x16xf32>, vector<8x8xf32> -> vector<8x8xf32>
    %77 = vector.broadcast %55 : vector<1x8xf32> to vector<8x8xf32>
    %78 = arith.addf %76, %77 : vector<8x8xf32>
    %cst_35 = arith.constant dense<0xFF800000> : vector<8xf32>
    %79 = vector.multi_reduction <maximumf>, %78, %cst_35 [1] : vector<8x8xf32> to vector<8xf32>
    %80 = vector.shape_cast %79 : vector<8xf32> to vector<8x1xf32>
    %81 = vector.broadcast %80 : vector<8x1xf32> to vector<8x8xf32>
    %82 = arith.subf %78, %81 : vector<8x8xf32>
    %83 = math.exp %82 : vector<8x8xf32>
    %cst_36 = arith.constant dense<0.000000e+00> : vector<8xf32>
    %84 = vector.multi_reduction <add>, %83, %cst_36 [1] : vector<8x8xf32> to vector<8xf32>
    %85 = vector.shape_cast %84 : vector<8xf32> to vector<8x1xf32>
    %86 = tpu.reciprocal %85 {approx = true} : vector<8x1xf32> -> vector<8x1xf32>
    %87 = vector.broadcast %86 : vector<8x1xf32> to vector<8x8xf32>
    %88 = arith.mulf %83, %87 : vector<8x8xf32>
    %cst_37 = arith.constant dense<0.000000e+00> : vector<8x16xf32>
    %89 = tpu.matmul %88, %75, %cst_37 {dimension_numbers = #tpu.dot_dimension_numbers<[1], [0], [0], [1], [0, 0, 1, 1], [], []>} : vector<8x8xf32>, vector<8x16xf32>, vector<8x16xf32> -> vector<8x16xf32>
    %90 = tpu.concatenate %72, %89 in 1 : vector<8x16xf32>, vector<8x16xf32> -> vector<8x32xf32>
    %91 = vector.extract_strided_slice %53 {offsets = [8, 0], sizes = [8, 128], strides = [1, 1]} : vector<16x128xf32> to vector<8x128xf32>
    %92 = vector.extract_strided_slice %24 {offsets = [1, 0], sizes = [1, 8], strides = [1, 1]} : vector<2x8xf32> to vector<1x8xf32>
    %93 = vector.extract_strided_slice %91 {offsets = [0, 0], sizes = [8, 16], strides = [1, 1]} : vector<8x128xf32> to vector<8x16xf32>
    %94 = vector.extract_strided_slice %91 {offsets = [0, 32], sizes = [8, 16], strides = [1, 1]} : vector<8x128xf32> to vector<8x16xf32>
    %95 = vector.extract_strided_slice %91 {offsets = [0, 64], sizes = [8, 16], strides = [1, 1]} : vector<8x128xf32> to vector<8x16xf32>
    %cst_38 = arith.constant dense<0.000000e+00> : vector<8x8xf32>
    %96 = tpu.matmul %93, %94, %cst_38 {dimension_numbers = #tpu.dot_dimension_numbers<[1], [1], [0], [0], [0, 0, 1, 0], [], []>} : vector<8x16xf32>, vector<8x16xf32>, vector<8x8xf32> -> vector<8x8xf32>
    %97 = vector.broadcast %92 : vector<1x8xf32> to vector<8x8xf32>
    %98 = arith.addf %96, %97 : vector<8x8xf32>
    %cst_39 = arith.constant dense<0xFF800000> : vector<8xf32>
    %99 = vector.multi_reduction <maximumf>, %98, %cst_39 [1] : vector<8x8xf32> to vector<8xf32>
    %100 = vector.shape_cast %99 : vector<8xf32> to vector<8x1xf32>
    %101 = vector.broadcast %100 : vector<8x1xf32> to vector<8x8xf32>
    %102 = arith.subf %98, %101 : vector<8x8xf32>
    %103 = math.exp %102 : vector<8x8xf32>
    %cst_40 = arith.constant dense<0.000000e+00> : vector<8xf32>
    %104 = vector.multi_reduction <add>, %103, %cst_40 [1] : vector<8x8xf32> to vector<8xf32>
    %105 = vector.shape_cast %104 : vector<8xf32> to vector<8x1xf32>
    %106 = tpu.reciprocal %105 {approx = true} : vector<8x1xf32> -> vector<8x1xf32>
    %107 = vector.broadcast %106 : vector<8x1xf32> to vector<8x8xf32>
    %108 = arith.mulf %103, %107 : vector<8x8xf32>
    %cst_41 = arith.constant dense<0.000000e+00> : vector<8x16xf32>
    %109 = tpu.matmul %108, %95, %cst_41 {dimension_numbers = #tpu.dot_dimension_numbers<[1], [0], [0], [1], [0, 0, 1, 1], [], []>} : vector<8x8xf32>, vector<8x16xf32>, vector<8x16xf32> -> vector<8x16xf32>
    %110 = vector.extract_strided_slice %91 {offsets = [0, 16], sizes = [8, 16], strides = [1, 1]} : vector<8x128xf32> to vector<8x16xf32>
    %111 = vector.extract_strided_slice %91 {offsets = [0, 48], sizes = [8, 16], strides = [1, 1]} : vector<8x128xf32> to vector<8x16xf32>
    %112 = vector.extract_strided_slice %91 {offsets = [0, 80], sizes = [8, 16], strides = [1, 1]} : vector<8x128xf32> to vector<8x16xf32>
    %cst_42 = arith.constant dense<0.000000e+00> : vector<8x8xf32>
    %113 = tpu.matmul %110, %111, %cst_42 {dimension_numbers = #tpu.dot_dimension_numbers<[1], [1], [0], [0], [0, 0, 1, 0], [], []>} : vector<8x16xf32>, vector<8x16xf32>, vector<8x8xf32> -> vector<8x8xf32>
    %114 = vector.broadcast %92 : vector<1x8xf32> to vector<8x8xf32>
    %115 = arith.addf %113, %114 : vector<8x8xf32>
    %cst_43 = arith.constant dense<0xFF800000> : vector<8xf32>
    %116 = vector.multi_reduction <maximumf>, %115, %cst_43 [1] : vector<8x8xf32> to vector<8xf32>
    %117 = vector.shape_cast %116 : vector<8xf32> to vector<8x1xf32>
    %118 = vector.broadcast %117 : vector<8x1xf32> to vector<8x8xf32>
    %119 = arith.subf %115, %118 : vector<8x8xf32>
    %120 = math.exp %119 : vector<8x8xf32>
    %cst_44 = arith.constant dense<0.000000e+00> : vector<8xf32>
    %121 = vector.multi_reduction <add>, %120, %cst_44 [1] : vector<8x8xf32> to vector<8xf32>
    %122 = vector.shape_cast %121 : vector<8xf32> to vector<8x1xf32>
    %123 = tpu.reciprocal %122 {approx = true} : vector<8x1xf32> -> vector<8x1xf32>
    %124 = vector.broadcast %123 : vector<8x1xf32> to vector<8x8xf32>
    %125 = arith.mulf %120, %124 : vector<8x8xf32>
    %cst_45 = arith.constant dense<0.000000e+00> : vector<8x16xf32>
    %126 = tpu.matmul %125, %112, %cst_45 {dimension_numbers = #tpu.dot_dimension_numbers<[1], [0], [0], [1], [0, 0, 1, 1], [], []>} : vector<8x8xf32>, vector<8x16xf32>, vector<8x16xf32> -> vector<8x16xf32>
    %127 = tpu.concatenate %109, %126 in 1 : vector<8x16xf32>, vector<8x16xf32> -> vector<8x32xf32>
    %128 = tpu.concatenate %90, %127 in 0 : vector<8x32xf32>, vector<8x32xf32> -> vector<16x32xf32>
    %c0_46 = arith.constant 0 : index
    %c0_47 = arith.constant 0 : index
    %c0_48 = arith.constant 0 : index
    %129 = vector.load %arg10[%c0_46, %c0_47, %c0_48] : memref<2x32x32xf32, #tpu.memory_space<vmem>>, vector<1x32x32xf32>
    %130 = vector.shape_cast %129 : vector<1x32x32xf32> to vector<32x32xf32>
    %cst_49 = arith.constant dense<0.000000e+00> : vector<16x32xf32>
    %131 = tpu.matmul %128, %130, %cst_49 {dimension_numbers = #tpu.dot_dimension_numbers<[1], [0], [0], [1], [0, 0, 1, 1], [], []>} : vector<16x32xf32>, vector<32x32xf32>, vector<16x32xf32> -> vector<16x32xf32>
    %c0_50 = arith.constant 0 : index
    %c0_51 = arith.constant 0 : index
    %c0_52 = arith.constant 0 : index
    %132 = vector.load %arg11[%c0_50, %c0_51, %c0_52] : memref<2x1x32xf32, #tpu.memory_space<vmem>>, vector<1x1x32xf32>
    %133 = vector.shape_cast %132 : vector<1x1x32xf32> to vector<1x32xf32>
    %134 = vector.broadcast %133 : vector<1x32xf32> to vector<16x32xf32>
    %135 = arith.addf %131, %134 : vector<16x32xf32>
    %136 = arith.addf %135, %46 : vector<16x32xf32>
    %c0_53 = arith.constant 0 : index
    %c0_54 = arith.constant 0 : index
    %c0_55 = arith.constant 0 : index
    %137 = vector.load %arg12[%c0_53, %c0_54, %c0_55] : memref<2x1x32xf32, #tpu.memory_space<vmem>>, vector<1x1x32xf32>
    %138 = vector.shape_cast %137 : vector<1x1x32xf32> to vector<1x32xf32>
    %c0_56 = arith.constant 0 : index
    %c0_57 = arith.constant 0 : index
    %c0_58 = arith.constant 0 : index
    %139 = vector.load %arg13[%c0_56, %c0_57, %c0_58] : memref<2x1x32xf32, #tpu.memory_space<vmem>>, vector<1x1x32xf32>
    %140 = vector.shape_cast %139 : vector<1x1x32xf32> to vector<1x32xf32>
    %cst_59 = arith.constant dense<0.000000e+00> : vector<16xf32>
    %141 = vector.multi_reduction <add>, %136, %cst_59 [1] : vector<16x32xf32> to vector<16xf32>
    %142 = vector.shape_cast %141 : vector<16xf32> to vector<16x1xf32>
    %cst_60 = arith.constant 3.200000e+01 : f32
    %143 = vector.broadcast %cst_60 : f32 to vector<16x1xf32>
    %144 = arith.divf %142, %143 : vector<16x1xf32>
    %145 = vector.broadcast %144 : vector<16x1xf32> to vector<16x32xf32>
    %146 = arith.subf %136, %145 : vector<16x32xf32>
    %147 = arith.mulf %146, %146 : vector<16x32xf32>
    %cst_61 = arith.constant dense<0.000000e+00> : vector<16xf32>
    %148 = vector.multi_reduction <add>, %147, %cst_61 [1] : vector<16x32xf32> to vector<16xf32>
    %149 = vector.shape_cast %148 : vector<16xf32> to vector<16x1xf32>
    %cst_62 = arith.constant 3.200000e+01 : f32
    %150 = vector.broadcast %cst_62 : f32 to vector<16x1xf32>
    %151 = arith.divf %149, %150 : vector<16x1xf32>
    %cst_63 = arith.constant 9.99999996E-13 : f32
    %152 = vector.broadcast %cst_63 : f32 to vector<16x1xf32>
    %153 = arith.addf %151, %152 : vector<16x1xf32>
    %154 = math.rsqrt %153 : vector<16x1xf32>
    %155 = vector.broadcast %154 : vector<16x1xf32> to vector<16x32xf32>
    %156 = arith.mulf %146, %155 : vector<16x32xf32>
    %157 = vector.broadcast %138 : vector<1x32xf32> to vector<16x32xf32>
    %158 = arith.mulf %156, %157 : vector<16x32xf32>
    %159 = vector.broadcast %140 : vector<1x32xf32> to vector<16x32xf32>
    %160 = arith.addf %158, %159 : vector<16x32xf32>
    %c0_64 = arith.constant 0 : index
    %c0_65 = arith.constant 0 : index
    %c0_66 = arith.constant 0 : index
    %161 = vector.load %arg14[%c0_64, %c0_65, %c0_66] : memref<2x32x64xf32, #tpu.memory_space<vmem>>, vector<1x32x64xf32>
    %162 = vector.shape_cast %161 : vector<1x32x64xf32> to vector<32x64xf32>
    %cst_67 = arith.constant dense<0.000000e+00> : vector<16x64xf32>
    %163 = tpu.matmul %160, %162, %cst_67 {dimension_numbers = #tpu.dot_dimension_numbers<[1], [0], [0], [1], [0, 0, 1, 1], [], []>} : vector<16x32xf32>, vector<32x64xf32>, vector<16x64xf32> -> vector<16x64xf32>
    %c0_68 = arith.constant 0 : index
    %c0_69 = arith.constant 0 : index
    %c0_70 = arith.constant 0 : index
    %164 = vector.load %arg15[%c0_68, %c0_69, %c0_70] : memref<2x1x64xf32, #tpu.memory_space<vmem>>, vector<1x1x64xf32>
    %165 = vector.shape_cast %164 : vector<1x1x64xf32> to vector<1x64xf32>
    %166 = vector.broadcast %165 : vector<1x64xf32> to vector<16x64xf32>
    %167 = arith.addf %163, %166 : vector<16x64xf32>
    %cst_71 = arith.constant 5.000000e-01 : f32
    %168 = vector.broadcast %cst_71 : f32 to vector<16x64xf32>
    %169 = arith.mulf %168, %167 : vector<16x64xf32>
    %cst_72 = arith.constant 0.707106769 : f32
    %170 = vector.broadcast %cst_72 : f32 to vector<16x64xf32>
    %171 = arith.mulf %167, %170 : vector<16x64xf32>
    %172 = math.erf %171 : vector<16x64xf32>
    %cst_73 = arith.constant 1.000000e+00 : f32
    %173 = vector.broadcast %cst_73 : f32 to vector<16x64xf32>
    %174 = arith.addf %173, %172 : vector<16x64xf32>
    %175 = arith.mulf %169, %174 : vector<16x64xf32>
    %c0_74 = arith.constant 0 : index
    %c0_75 = arith.constant 0 : index
    %c0_76 = arith.constant 0 : index
    %176 = vector.load %arg16[%c0_74, %c0_75, %c0_76] : memref<2x64x32xf32, #tpu.memory_space<vmem>>, vector<1x64x32xf32>
    %177 = vector.shape_cast %176 : vector<1x64x32xf32> to vector<64x32xf32>
    %cst_77 = arith.constant dense<0.000000e+00> : vector<16x32xf32>
    %178 = tpu.matmul %175, %177, %cst_77 {dimension_numbers = #tpu.dot_dimension_numbers<[1], [0], [0], [1], [0, 0, 1, 1], [], []>} : vector<16x64xf32>, vector<64x32xf32>, vector<16x32xf32> -> vector<16x32xf32>
    %c0_78 = arith.constant 0 : index
    %c0_79 = arith.constant 0 : index
    %c0_80 = arith.constant 0 : index
    %179 = vector.load %arg17[%c0_78, %c0_79, %c0_80] : memref<2x1x32xf32, #tpu.memory_space<vmem>>, vector<1x1x32xf32>
    %180 = vector.shape_cast %179 : vector<1x1x32xf32> to vector<1x32xf32>
    %181 = vector.broadcast %180 : vector<1x32xf32> to vector<16x32xf32>
    %182 = arith.addf %178, %181 : vector<16x32xf32>
    %183 = arith.addf %182, %160 : vector<16x32xf32>
    %c0_81 = arith.constant 0 : index
    %c0_82 = arith.constant 0 : index
    %c0_83 = arith.constant 0 : index
    %184 = vector.load %arg18[%c0_81, %c0_82, %c0_83] : memref<2x1x32xf32, #tpu.memory_space<vmem>>, vector<1x1x32xf32>
    %185 = vector.shape_cast %184 : vector<1x1x32xf32> to vector<1x32xf32>
    %c0_84 = arith.constant 0 : index
    %c0_85 = arith.constant 0 : index
    %c0_86 = arith.constant 0 : index
    %186 = vector.load %arg19[%c0_84, %c0_85, %c0_86] : memref<2x1x32xf32, #tpu.memory_space<vmem>>, vector<1x1x32xf32>
    %187 = vector.shape_cast %186 : vector<1x1x32xf32> to vector<1x32xf32>
    %cst_87 = arith.constant dense<0.000000e+00> : vector<16xf32>
    %188 = vector.multi_reduction <add>, %183, %cst_87 [1] : vector<16x32xf32> to vector<16xf32>
    %189 = vector.shape_cast %188 : vector<16xf32> to vector<16x1xf32>
    %cst_88 = arith.constant 3.200000e+01 : f32
    %190 = vector.broadcast %cst_88 : f32 to vector<16x1xf32>
    %191 = arith.divf %189, %190 : vector<16x1xf32>
    %192 = vector.broadcast %191 : vector<16x1xf32> to vector<16x32xf32>
    %193 = arith.subf %183, %192 : vector<16x32xf32>
    %194 = arith.mulf %193, %193 : vector<16x32xf32>
    %cst_89 = arith.constant dense<0.000000e+00> : vector<16xf32>
    %195 = vector.multi_reduction <add>, %194, %cst_89 [1] : vector<16x32xf32> to vector<16xf32>
    %196 = vector.shape_cast %195 : vector<16xf32> to vector<16x1xf32>
    %cst_90 = arith.constant 3.200000e+01 : f32
    %197 = vector.broadcast %cst_90 : f32 to vector<16x1xf32>
    %198 = arith.divf %196, %197 : vector<16x1xf32>
    %cst_91 = arith.constant 9.99999996E-13 : f32
    %199 = vector.broadcast %cst_91 : f32 to vector<16x1xf32>
    %200 = arith.addf %198, %199 : vector<16x1xf32>
    %201 = math.rsqrt %200 : vector<16x1xf32>
    %202 = vector.broadcast %201 : vector<16x1xf32> to vector<16x32xf32>
    %203 = arith.mulf %193, %202 : vector<16x32xf32>
    %204 = vector.broadcast %185 : vector<1x32xf32> to vector<16x32xf32>
    %205 = arith.mulf %203, %204 : vector<16x32xf32>
    %206 = vector.broadcast %187 : vector<1x32xf32> to vector<16x32xf32>
    %207 = arith.addf %205, %206 : vector<16x32xf32>
    %c1 = arith.constant 1 : index
    %c0_92 = arith.constant 0 : index
    %c0_93 = arith.constant 0 : index
    %208 = vector.load %arg8[%c1, %c0_92, %c0_93] : memref<2x32x128xf32, #tpu.memory_space<vmem>>, vector<1x32x128xf32>
    %209 = vector.shape_cast %208 : vector<1x32x128xf32> to vector<32x128xf32>
    %cst_94 = arith.constant dense<0.000000e+00> : vector<16x128xf32>
    %210 = tpu.matmul %207, %209, %cst_94 {dimension_numbers = #tpu.dot_dimension_numbers<[1], [0], [0], [1], [0, 0, 1, 1], [], []>} : vector<16x32xf32>, vector<32x128xf32>, vector<16x128xf32> -> vector<16x128xf32>
    %c1_95 = arith.constant 1 : index
    %c0_96 = arith.constant 0 : index
    %c0_97 = arith.constant 0 : index
    %211 = vector.load %arg9[%c1_95, %c0_96, %c0_97] : memref<2x1x128xf32, #tpu.memory_space<vmem>>, vector<1x1x128xf32>
    %212 = vector.shape_cast %211 : vector<1x1x128xf32> to vector<1x128xf32>
    %213 = vector.broadcast %212 : vector<1x128xf32> to vector<16x128xf32>
    %214 = arith.addf %210, %213 : vector<16x128xf32>
    %215 = vector.extract_strided_slice %214 {offsets = [0, 0], sizes = [8, 128], strides = [1, 1]} : vector<16x128xf32> to vector<8x128xf32>
    %216 = vector.extract_strided_slice %24 {offsets = [0, 0], sizes = [1, 8], strides = [1, 1]} : vector<2x8xf32> to vector<1x8xf32>
    %217 = vector.extract_strided_slice %215 {offsets = [0, 0], sizes = [1, 16], strides = [1, 1]} : vector<8x128xf32> to vector<1x16xf32>
    %218 = vector.extract_strided_slice %215 {offsets = [0, 32], sizes = [8, 16], strides = [1, 1]} : vector<8x128xf32> to vector<8x16xf32>
    %219 = vector.extract_strided_slice %215 {offsets = [0, 64], sizes = [8, 16], strides = [1, 1]} : vector<8x128xf32> to vector<8x16xf32>
    %cst_98 = arith.constant dense<0.000000e+00> : vector<1x8xf32>
    %220 = tpu.matmul %217, %218, %cst_98 {dimension_numbers = #tpu.dot_dimension_numbers<[1], [1], [0], [0], [0, 0, 1, 0], [], []>} : vector<1x16xf32>, vector<8x16xf32>, vector<1x8xf32> -> vector<1x8xf32>
    %221 = arith.addf %220, %216 : vector<1x8xf32>
    %cst_99 = arith.constant dense<0xFF800000> : vector<1xf32>
    %222 = vector.multi_reduction <maximumf>, %221, %cst_99 [1] : vector<1x8xf32> to vector<1xf32>
    %223 = vector.shape_cast %222 : vector<1xf32> to vector<1x1xf32>
    %224 = vector.broadcast %223 : vector<1x1xf32> to vector<1x8xf32>
    %225 = arith.subf %221, %224 : vector<1x8xf32>
    %226 = math.exp %225 : vector<1x8xf32>
    %cst_100 = arith.constant dense<0.000000e+00> : vector<1xf32>
    %227 = vector.multi_reduction <add>, %226, %cst_100 [1] : vector<1x8xf32> to vector<1xf32>
    %228 = vector.shape_cast %227 : vector<1xf32> to vector<1x1xf32>
    %229 = tpu.reciprocal %228 {approx = true} : vector<1x1xf32> -> vector<1x1xf32>
    %230 = vector.broadcast %229 : vector<1x1xf32> to vector<1x8xf32>
    %231 = arith.mulf %226, %230 : vector<1x8xf32>
    %cst_101 = arith.constant dense<0.000000e+00> : vector<1x16xf32>
    %232 = tpu.matmul %231, %219, %cst_101 {dimension_numbers = #tpu.dot_dimension_numbers<[1], [0], [0], [1], [0, 0, 1, 1], [], []>} : vector<1x8xf32>, vector<8x16xf32>, vector<1x16xf32> -> vector<1x16xf32>
    %233 = vector.extract_strided_slice %215 {offsets = [0, 16], sizes = [1, 16], strides = [1, 1]} : vector<8x128xf32> to vector<1x16xf32>
    %234 = vector.extract_strided_slice %215 {offsets = [0, 48], sizes = [8, 16], strides = [1, 1]} : vector<8x128xf32> to vector<8x16xf32>
    %235 = vector.extract_strided_slice %215 {offsets = [0, 80], sizes = [8, 16], strides = [1, 1]} : vector<8x128xf32> to vector<8x16xf32>
    %cst_102 = arith.constant dense<0.000000e+00> : vector<1x8xf32>
    %236 = tpu.matmul %233, %234, %cst_102 {dimension_numbers = #tpu.dot_dimension_numbers<[1], [1], [0], [0], [0, 0, 1, 0], [], []>} : vector<1x16xf32>, vector<8x16xf32>, vector<1x8xf32> -> vector<1x8xf32>
    %237 = arith.addf %236, %216 : vector<1x8xf32>
    %cst_103 = arith.constant dense<0xFF800000> : vector<1xf32>
    %238 = vector.multi_reduction <maximumf>, %237, %cst_103 [1] : vector<1x8xf32> to vector<1xf32>
    %239 = vector.shape_cast %238 : vector<1xf32> to vector<1x1xf32>
    %240 = vector.broadcast %239 : vector<1x1xf32> to vector<1x8xf32>
    %241 = arith.subf %237, %240 : vector<1x8xf32>
    %242 = math.exp %241 : vector<1x8xf32>
    %cst_104 = arith.constant dense<0.000000e+00> : vector<1xf32>
    %243 = vector.multi_reduction <add>, %242, %cst_104 [1] : vector<1x8xf32> to vector<1xf32>
    %244 = vector.shape_cast %243 : vector<1xf32> to vector<1x1xf32>
    %245 = tpu.reciprocal %244 {approx = true} : vector<1x1xf32> -> vector<1x1xf32>
    %246 = vector.broadcast %245 : vector<1x1xf32> to vector<1x8xf32>
    %247 = arith.mulf %242, %246 : vector<1x8xf32>
    %cst_105 = arith.constant dense<0.000000e+00> : vector<1x16xf32>
    %248 = tpu.matmul %247, %235, %cst_105 {dimension_numbers = #tpu.dot_dimension_numbers<[1], [0], [0], [1], [0, 0, 1, 1], [], []>} : vector<1x8xf32>, vector<8x16xf32>, vector<1x16xf32> -> vector<1x16xf32>
    %249 = tpu.concatenate %232, %248 in 1 : vector<1x16xf32>, vector<1x16xf32> -> vector<1x32xf32>
    %250 = vector.extract_strided_slice %214 {offsets = [8, 0], sizes = [8, 128], strides = [1, 1]} : vector<16x128xf32> to vector<8x128xf32>
    %251 = vector.extract_strided_slice %24 {offsets = [1, 0], sizes = [1, 8], strides = [1, 1]} : vector<2x8xf32> to vector<1x8xf32>
    %252 = vector.extract_strided_slice %250 {offsets = [0, 0], sizes = [1, 16], strides = [1, 1]} : vector<8x128xf32> to vector<1x16xf32>
    %253 = vector.extract_strided_slice %250 {offsets = [0, 32], sizes = [8, 16], strides = [1, 1]} : vector<8x128xf32> to vector<8x16xf32>
    %254 = vector.extract_strided_slice %250 {offsets = [0, 64], sizes = [8, 16], strides = [1, 1]} : vector<8x128xf32> to vector<8x16xf32>
    %cst_106 = arith.constant dense<0.000000e+00> : vector<1x8xf32>
    %255 = tpu.matmul %252, %253, %cst_106 {dimension_numbers = #tpu.dot_dimension_numbers<[1], [1], [0], [0], [0, 0, 1, 0], [], []>} : vector<1x16xf32>, vector<8x16xf32>, vector<1x8xf32> -> vector<1x8xf32>
    %256 = arith.addf %255, %251 : vector<1x8xf32>
    %cst_107 = arith.constant dense<0xFF800000> : vector<1xf32>
    %257 = vector.multi_reduction <maximumf>, %256, %cst_107 [1] : vector<1x8xf32> to vector<1xf32>
    %258 = vector.shape_cast %257 : vector<1xf32> to vector<1x1xf32>
    %259 = vector.broadcast %258 : vector<1x1xf32> to vector<1x8xf32>
    %260 = arith.subf %256, %259 : vector<1x8xf32>
    %261 = math.exp %260 : vector<1x8xf32>
    %cst_108 = arith.constant dense<0.000000e+00> : vector<1xf32>
    %262 = vector.multi_reduction <add>, %261, %cst_108 [1] : vector<1x8xf32> to vector<1xf32>
    %263 = vector.shape_cast %262 : vector<1xf32> to vector<1x1xf32>
    %264 = tpu.reciprocal %263 {approx = true} : vector<1x1xf32> -> vector<1x1xf32>
    %265 = vector.broadcast %264 : vector<1x1xf32> to vector<1x8xf32>
    %266 = arith.mulf %261, %265 : vector<1x8xf32>
    %cst_109 = arith.constant dense<0.000000e+00> : vector<1x16xf32>
    %267 = tpu.matmul %266, %254, %cst_109 {dimension_numbers = #tpu.dot_dimension_numbers<[1], [0], [0], [1], [0, 0, 1, 1], [], []>} : vector<1x8xf32>, vector<8x16xf32>, vector<1x16xf32> -> vector<1x16xf32>
    %268 = vector.extract_strided_slice %250 {offsets = [0, 16], sizes = [1, 16], strides = [1, 1]} : vector<8x128xf32> to vector<1x16xf32>
    %269 = vector.extract_strided_slice %250 {offsets = [0, 48], sizes = [8, 16], strides = [1, 1]} : vector<8x128xf32> to vector<8x16xf32>
    %270 = vector.extract_strided_slice %250 {offsets = [0, 80], sizes = [8, 16], strides = [1, 1]} : vector<8x128xf32> to vector<8x16xf32>
    %cst_110 = arith.constant dense<0.000000e+00> : vector<1x8xf32>
    %271 = tpu.matmul %268, %269, %cst_110 {dimension_numbers = #tpu.dot_dimension_numbers<[1], [1], [0], [0], [0, 0, 1, 0], [], []>} : vector<1x16xf32>, vector<8x16xf32>, vector<1x8xf32> -> vector<1x8xf32>
    %272 = arith.addf %271, %251 : vector<1x8xf32>
    %cst_111 = arith.constant dense<0xFF800000> : vector<1xf32>
    %273 = vector.multi_reduction <maximumf>, %272, %cst_111 [1] : vector<1x8xf32> to vector<1xf32>
    %274 = vector.shape_cast %273 : vector<1xf32> to vector<1x1xf32>
    %275 = vector.broadcast %274 : vector<1x1xf32> to vector<1x8xf32>
    %276 = arith.subf %272, %275 : vector<1x8xf32>
    %277 = math.exp %276 : vector<1x8xf32>
    %cst_112 = arith.constant dense<0.000000e+00> : vector<1xf32>
    %278 = vector.multi_reduction <add>, %277, %cst_112 [1] : vector<1x8xf32> to vector<1xf32>
    %279 = vector.shape_cast %278 : vector<1xf32> to vector<1x1xf32>
    %280 = tpu.reciprocal %279 {approx = true} : vector<1x1xf32> -> vector<1x1xf32>
    %281 = vector.broadcast %280 : vector<1x1xf32> to vector<1x8xf32>
    %282 = arith.mulf %277, %281 : vector<1x8xf32>
    %cst_113 = arith.constant dense<0.000000e+00> : vector<1x16xf32>
    %283 = tpu.matmul %282, %270, %cst_113 {dimension_numbers = #tpu.dot_dimension_numbers<[1], [0], [0], [1], [0, 0, 1, 1], [], []>} : vector<1x8xf32>, vector<8x16xf32>, vector<1x16xf32> -> vector<1x16xf32>
    %284 = tpu.concatenate %267, %283 in 1 : vector<1x16xf32>, vector<1x16xf32> -> vector<1x32xf32>
    %285 = tpu.concatenate %249, %284 in 0 : vector<1x32xf32>, vector<1x32xf32> -> vector<2x32xf32>
    %286 = vector.extract_strided_slice %207 {offsets = [0, 0], sizes = [1, 32], strides = [1, 1]} : vector<16x32xf32> to vector<1x32xf32>
    %287 = vector.extract_strided_slice %207 {offsets = [8, 0], sizes = [1, 32], strides = [1, 1]} : vector<16x32xf32> to vector<1x32xf32>
    %288 = tpu.concatenate %286, %287 in 0 : vector<1x32xf32>, vector<1x32xf32> -> vector<2x32xf32>
    %c1_114 = arith.constant 1 : index
    %c0_115 = arith.constant 0 : index
    %c0_116 = arith.constant 0 : index
    %289 = vector.load %arg10[%c1_114, %c0_115, %c0_116] : memref<2x32x32xf32, #tpu.memory_space<vmem>>, vector<1x32x32xf32>
    %290 = vector.shape_cast %289 : vector<1x32x32xf32> to vector<32x32xf32>
    %cst_117 = arith.constant dense<0.000000e+00> : vector<2x32xf32>
    %291 = tpu.matmul %285, %290, %cst_117 {dimension_numbers = #tpu.dot_dimension_numbers<[1], [0], [0], [1], [0, 0, 1, 1], [], []>} : vector<2x32xf32>, vector<32x32xf32>, vector<2x32xf32> -> vector<2x32xf32>
    %c1_118 = arith.constant 1 : index
    %c0_119 = arith.constant 0 : index
    %c0_120 = arith.constant 0 : index
    %292 = vector.load %arg11[%c1_118, %c0_119, %c0_120] : memref<2x1x32xf32, #tpu.memory_space<vmem>>, vector<1x1x32xf32>
    %293 = vector.shape_cast %292 : vector<1x1x32xf32> to vector<1x32xf32>
    %294 = vector.broadcast %293 : vector<1x32xf32> to vector<2x32xf32>
    %295 = arith.addf %291, %294 : vector<2x32xf32>
    %296 = arith.addf %295, %288 : vector<2x32xf32>
    %c1_121 = arith.constant 1 : index
    %c0_122 = arith.constant 0 : index
    %c0_123 = arith.constant 0 : index
    %297 = vector.load %arg12[%c1_121, %c0_122, %c0_123] : memref<2x1x32xf32, #tpu.memory_space<vmem>>, vector<1x1x32xf32>
    %298 = vector.shape_cast %297 : vector<1x1x32xf32> to vector<1x32xf32>
    %c1_124 = arith.constant 1 : index
    %c0_125 = arith.constant 0 : index
    %c0_126 = arith.constant 0 : index
    %299 = vector.load %arg13[%c1_124, %c0_125, %c0_126] : memref<2x1x32xf32, #tpu.memory_space<vmem>>, vector<1x1x32xf32>
    %300 = vector.shape_cast %299 : vector<1x1x32xf32> to vector<1x32xf32>
    %cst_127 = arith.constant dense<0.000000e+00> : vector<2xf32>
    %301 = vector.multi_reduction <add>, %296, %cst_127 [1] : vector<2x32xf32> to vector<2xf32>
    %302 = vector.shape_cast %301 : vector<2xf32> to vector<2x1xf32>
    %cst_128 = arith.constant 3.200000e+01 : f32
    %303 = vector.broadcast %cst_128 : f32 to vector<2x1xf32>
    %304 = arith.divf %302, %303 : vector<2x1xf32>
    %305 = vector.broadcast %304 : vector<2x1xf32> to vector<2x32xf32>
    %306 = arith.subf %296, %305 : vector<2x32xf32>
    %307 = arith.mulf %306, %306 : vector<2x32xf32>
    %cst_129 = arith.constant dense<0.000000e+00> : vector<2xf32>
    %308 = vector.multi_reduction <add>, %307, %cst_129 [1] : vector<2x32xf32> to vector<2xf32>
    %309 = vector.shape_cast %308 : vector<2xf32> to vector<2x1xf32>
    %cst_130 = arith.constant 3.200000e+01 : f32
    %310 = vector.broadcast %cst_130 : f32 to vector<2x1xf32>
    %311 = arith.divf %309, %310 : vector<2x1xf32>
    %cst_131 = arith.constant 9.99999996E-13 : f32
    %312 = vector.broadcast %cst_131 : f32 to vector<2x1xf32>
    %313 = arith.addf %311, %312 : vector<2x1xf32>
    %314 = math.rsqrt %313 : vector<2x1xf32>
    %315 = vector.broadcast %314 : vector<2x1xf32> to vector<2x32xf32>
    %316 = arith.mulf %306, %315 : vector<2x32xf32>
    %317 = vector.broadcast %298 : vector<1x32xf32> to vector<2x32xf32>
    %318 = arith.mulf %316, %317 : vector<2x32xf32>
    %319 = vector.broadcast %300 : vector<1x32xf32> to vector<2x32xf32>
    %320 = arith.addf %318, %319 : vector<2x32xf32>
    %c1_132 = arith.constant 1 : index
    %c0_133 = arith.constant 0 : index
    %c0_134 = arith.constant 0 : index
    %321 = vector.load %arg14[%c1_132, %c0_133, %c0_134] : memref<2x32x64xf32, #tpu.memory_space<vmem>>, vector<1x32x64xf32>
    %322 = vector.shape_cast %321 : vector<1x32x64xf32> to vector<32x64xf32>
    %cst_135 = arith.constant dense<0.000000e+00> : vector<2x64xf32>
    %323 = tpu.matmul %320, %322, %cst_135 {dimension_numbers = #tpu.dot_dimension_numbers<[1], [0], [0], [1], [0, 0, 1, 1], [], []>} : vector<2x32xf32>, vector<32x64xf32>, vector<2x64xf32> -> vector<2x64xf32>
    %c1_136 = arith.constant 1 : index
    %c0_137 = arith.constant 0 : index
    %c0_138 = arith.constant 0 : index
    %324 = vector.load %arg15[%c1_136, %c0_137, %c0_138] : memref<2x1x64xf32, #tpu.memory_space<vmem>>, vector<1x1x64xf32>
    %325 = vector.shape_cast %324 : vector<1x1x64xf32> to vector<1x64xf32>
    %326 = vector.broadcast %325 : vector<1x64xf32> to vector<2x64xf32>
    %327 = arith.addf %323, %326 : vector<2x64xf32>
    %cst_139 = arith.constant 5.000000e-01 : f32
    %328 = vector.broadcast %cst_139 : f32 to vector<2x64xf32>
    %329 = arith.mulf %328, %327 : vector<2x64xf32>
    %cst_140 = arith.constant 0.707106769 : f32
    %330 = vector.broadcast %cst_140 : f32 to vector<2x64xf32>
    %331 = arith.mulf %327, %330 : vector<2x64xf32>
    %332 = math.erf %331 : vector<2x64xf32>
    %cst_141 = arith.constant 1.000000e+00 : f32
    %333 = vector.broadcast %cst_141 : f32 to vector<2x64xf32>
    %334 = arith.addf %333, %332 : vector<2x64xf32>
    %335 = arith.mulf %329, %334 : vector<2x64xf32>
    %c1_142 = arith.constant 1 : index
    %c0_143 = arith.constant 0 : index
    %c0_144 = arith.constant 0 : index
    %336 = vector.load %arg16[%c1_142, %c0_143, %c0_144] : memref<2x64x32xf32, #tpu.memory_space<vmem>>, vector<1x64x32xf32>
    %337 = vector.shape_cast %336 : vector<1x64x32xf32> to vector<64x32xf32>
    %cst_145 = arith.constant dense<0.000000e+00> : vector<2x32xf32>
    %338 = tpu.matmul %335, %337, %cst_145 {dimension_numbers = #tpu.dot_dimension_numbers<[1], [0], [0], [1], [0, 0, 1, 1], [], []>} : vector<2x64xf32>, vector<64x32xf32>, vector<2x32xf32> -> vector<2x32xf32>
    %c1_146 = arith.constant 1 : index
    %c0_147 = arith.constant 0 : index
    %c0_148 = arith.constant 0 : index
    %339 = vector.load %arg17[%c1_146, %c0_147, %c0_148] : memref<2x1x32xf32, #tpu.memory_space<vmem>>, vector<1x1x32xf32>
    %340 = vector.shape_cast %339 : vector<1x1x32xf32> to vector<1x32xf32>
    %341 = vector.broadcast %340 : vector<1x32xf32> to vector<2x32xf32>
    %342 = arith.addf %338, %341 : vector<2x32xf32>
    %343 = arith.addf %342, %320 : vector<2x32xf32>
    %c1_149 = arith.constant 1 : index
    %c0_150 = arith.constant 0 : index
    %c0_151 = arith.constant 0 : index
    %344 = vector.load %arg18[%c1_149, %c0_150, %c0_151] : memref<2x1x32xf32, #tpu.memory_space<vmem>>, vector<1x1x32xf32>
    %345 = vector.shape_cast %344 : vector<1x1x32xf32> to vector<1x32xf32>
    %c1_152 = arith.constant 1 : index
    %c0_153 = arith.constant 0 : index
    %c0_154 = arith.constant 0 : index
    %346 = vector.load %arg19[%c1_152, %c0_153, %c0_154] : memref<2x1x32xf32, #tpu.memory_space<vmem>>, vector<1x1x32xf32>
    %347 = vector.shape_cast %346 : vector<1x1x32xf32> to vector<1x32xf32>
    %cst_155 = arith.constant dense<0.000000e+00> : vector<2xf32>
    %348 = vector.multi_reduction <add>, %343, %cst_155 [1] : vector<2x32xf32> to vector<2xf32>
    %349 = vector.shape_cast %348 : vector<2xf32> to vector<2x1xf32>
    %cst_156 = arith.constant 3.200000e+01 : f32
    %350 = vector.broadcast %cst_156 : f32 to vector<2x1xf32>
    %351 = arith.divf %349, %350 : vector<2x1xf32>
    %352 = vector.broadcast %351 : vector<2x1xf32> to vector<2x32xf32>
    %353 = arith.subf %343, %352 : vector<2x32xf32>
    %354 = arith.mulf %353, %353 : vector<2x32xf32>
    %cst_157 = arith.constant dense<0.000000e+00> : vector<2xf32>
    %355 = vector.multi_reduction <add>, %354, %cst_157 [1] : vector<2x32xf32> to vector<2xf32>
    %356 = vector.shape_cast %355 : vector<2xf32> to vector<2x1xf32>
    %cst_158 = arith.constant 3.200000e+01 : f32
    %357 = vector.broadcast %cst_158 : f32 to vector<2x1xf32>
    %358 = arith.divf %356, %357 : vector<2x1xf32>
    %cst_159 = arith.constant 9.99999996E-13 : f32
    %359 = vector.broadcast %cst_159 : f32 to vector<2x1xf32>
    %360 = arith.addf %358, %359 : vector<2x1xf32>
    %361 = math.rsqrt %360 : vector<2x1xf32>
    %362 = vector.broadcast %361 : vector<2x1xf32> to vector<2x32xf32>
    %363 = arith.mulf %353, %362 : vector<2x32xf32>
    %364 = vector.broadcast %345 : vector<1x32xf32> to vector<2x32xf32>
    %365 = arith.mulf %363, %364 : vector<2x32xf32>
    %366 = vector.broadcast %347 : vector<1x32xf32> to vector<2x32xf32>
    %367 = arith.addf %365, %366 : vector<2x32xf32>
    %c0_160 = arith.constant 0 : index
    %c0_161 = arith.constant 0 : index
    %368 = vector.load %arg20[%c0_160, %c0_161] : memref<32x32xf32, #tpu.memory_space<vmem>>, vector<32x32xf32>
    %cst_162 = arith.constant dense<0.000000e+00> : vector<2x32xf32>
    %369 = tpu.matmul %367, %368, %cst_162 {dimension_numbers = #tpu.dot_dimension_numbers<[1], [0], [0], [1], [0, 0, 1, 1], [], []>} : vector<2x32xf32>, vector<32x32xf32>, vector<2x32xf32> -> vector<2x32xf32>
    %c0_163 = arith.constant 0 : index
    %c0_164 = arith.constant 0 : index
    %370 = vector.load %arg21[%c0_163, %c0_164] : memref<1x32xf32, #tpu.memory_space<vmem>>, vector<1x32xf32>
    %371 = vector.broadcast %370 : vector<1x32xf32> to vector<2x32xf32>
    %372 = arith.addf %369, %371 : vector<2x32xf32>
    %373 = math.tanh %372 : vector<2x32xf32>
    %c0_165 = arith.constant 0 : index
    %c0_166 = arith.constant 0 : index
    %374 = vector.load %arg22[%c0_165, %c0_166] : memref<1x32xf32, #tpu.memory_space<vmem>>, vector<1x32xf32>
    %375 = vector.broadcast %374 : vector<1x32xf32> to vector<2x32xf32>
    %376 = arith.mulf %373, %375 : vector<2x32xf32>
    %cst_167 = arith.constant dense<0.000000e+00> : vector<2xf32>
    %377 = vector.multi_reduction <add>, %376, %cst_167 [1] : vector<2x32xf32> to vector<2xf32>
    %378 = vector.shape_cast %377 : vector<2xf32> to vector<2x1xf32>
    %c0_168 = arith.constant 0 : index
    %c0_169 = arith.constant 0 : index
    %379 = vector.load %arg23[%c0_168, %c0_169] : memref<1x1xf32, #tpu.memory_space<vmem>>, vector<1x1xf32>
    %380 = vector.broadcast %379 : vector<1x1xf32> to vector<2x1xf32>
    %381 = arith.addf %378, %380 : vector<2x1xf32>
    %382 = vector.shape_cast %381 : vector<2x1xf32> to vector<2x1xf32>
    %383 = vector.broadcast %382 : vector<2x1xf32> to vector<2x128xf32>
    %cst_170 = arith.constant 0.000000e+00 : f32
    %384 = vector.broadcast %cst_170 : f32 to vector<6x128xf32>
    %385 = tpu.concatenate %383, %384 in 0 : vector<2x128xf32>, vector<6x128xf32> -> vector<8x128xf32>
    %c0_171 = arith.constant 0 : index
    %c0_172 = arith.constant 0 : index
    %386 = vector.load %arg24[%c0_171, %c0_172] : memref<8x128xf32, #tpu.memory_space<vmem>>, vector<8x128xf32>
    tpu.vector_store %arg24[%c0_171, %c0_172], %385 {strides = array<i32>} : memref<8x128xf32, #tpu.memory_space<vmem>>, vector<8x128xf32>,
    return
  }
}

</mosaic_0001>

<bundles_post_ra>
// kernel: bert_regression_forward.1
= control target key start
LH: loop header
LB: loop body
LE: loop exit
PB: predicated region body
PF: predicated region fallthrough
CT: control target
= control target key end

     0   :  { %v3327_v0 = vmov 0   ;;  %vm130_vm0 = vcmask 1041408   ;;  %v81_v9 = vlaneseq  ;;  %vm123_vm1 = vcmask 15360   ;;  %s3335_s30 = smov 16   ;;  %s3949_s1 = inlined_call_operand.vmem [shape: s32[16,1], index: 1, kind: input, shape index: {}]   ;;  %s3950_s0 = inlined_call_operand.vmem [shape: s32[16,1], index: 0, kind: input, shape index: {}]   ;;  %s3951_s5 = inlined_call_operand.vmem [shape: f32[2,32], index: 5, kind: input, shape index: {}]   ;;  %s3952_s3 = inlined_call_operand.vmem [shape: f32[100,32], index: 3, kind: input, shape index: {}]   ;;  %s3953_s4 = inlined_call_operand.vmem [shape: f32[64,32], index: 4, kind: input, shape index: {}]   ;;  %s3954_s8 = inlined_call_operand.vmem [shape: f32[2,32,128], index: 8, kind: input, shape index: {}]   ;;  %s3955_s6 = inlined_call_operand.vmem [shape: f32[1,32], index: 6, kind: input, shape index: {}]   ;;  %s3956_s7 = inlined_call_operand.vmem [shape: f32[1,32], index: 7, kind: input, shape index: {}]   ;;  %s3957_s9 = inlined_call_operand.vmem [shape: f32[2,1,128], index: 9, kind: input, shape index: {}]   ;;  %s3958_s2 = inlined_call_operand.vmem [shape: f32[2,8], index: 2, kind: input, shape index: {}]   ;;  %s3959_s10 = inlined_call_operand.vmem [shape: f32[2,32,32], index: 10, kind: input, shape index: {}]   ;;  %s3960_s11 = inlined_call_operand.vmem [shape: f32[2,1,32], index: 11, kind: input, shape index: {}]   ;;  %s3961_s14 = inlined_call_operand.vmem [shape: f32[2,32,64], index: 14, kind: input, shape index: {}]   ;;  %s3962_s12 = inlined_call_operand.vmem [shape: f32[2,1,32], index: 12, kind: input, shape index: {}]   ;;  %s3963_s13 = inlined_call_operand.vmem [shape: f32[2,1,32], index: 13, kind: input, shape index: {}]   ;;  %s3964_s16 = inlined_call_operand.vmem [shape: f32[2,64,32], index: 16, kind: input, shape index: {}]   ;;  %s3965_s15 = inlined_call_operand.vmem [shape: f32[2,1,64], index: 15, kind: input, shape index: {}]   ;;  %s3966_s17 = inlined_call_operand.vmem [shape: f32[2,1,32], index: 17, kind: input, shape index: {}]   ;;  %s3967_s18 = inlined_call_operand.vmem [shape: f32[2,1,32], index: 18, kind: input, shape index: {}]   ;;  %s3968_s19 = inlined_call_operand.vmem [shape: f32[2,1,32], index: 19, kind: input, shape index: {}]   ;;  %s3969_s20 = inlined_call_operand.vmem [shape: f32[32,32], index: 20, kind: input, shape index: {}]   ;;  %s3970_s23 = inlined_call_operand.<no memory space> [shape: f32[1,1], index: 23, kind: input, shape index: {}]   ;;  %s3971_s21 = inlined_call_operand.vmem [shape: f32[1,32], index: 21, kind: input, shape index: {}]   ;;  %s3972_s22 = inlined_call_operand.vmem [shape: f32[1,32], index: 22, kind: input, shape index: {}]   ;;  %s3973_s24 = inlined_call_operand.vmem [shape: f32[8,128], index: 24, kind: output, shape index: {}]  }
   0x1   :  { %3979 = sst [smem:[#allocation3_spill]] %s3949_s1  ;;  %3269 = vset.pattern.permute.xlu0 %v3327_v0  ;;  %3270 = vset.pattern.permute.xlu1 %v3327_v0  ;;  %v3328_v13 = vmov 0.0   ;;  %vm209_vm5 = vcmask 818176   ;;  %vm216_vm6 = vcmask 1043456   ;;  %vm303_vm8 = vcmask 261120  }
   0x2   :  { %3980 = sst [smem:[#allocation4_spill]] %s3950_s0  ;;  %s3988_s27 = sld [smem:[#allocation3_spill]]  ;;  %v82_v10 = vand.u32 127, %v81_v9  ;;  %vm3329_vm9 = vmmov 0   ;;  %vm446_vm10 = vcmask 130048   ;;  %vm521_vm11 = vcmask 64512  }
   0x3   :  { %3981 = sst [smem:[#allocation5_spill]] %s3951_s5  ;;  %s3989_s5 = sld [smem:[#allocation4_spill]]  ;;  %vm1372_vm12 = vcmask 523264   ;;  %vm2269_vm13 = vcmask 1040384   ;;  %vm1671_vm14 = vcmask 57344   ;;  %vm2365_vm15 = vcmask 254976  }
   0x4   :  { %3982 = sst [smem:[#allocation6_spill]] %s3952_s3 }
   0x5   :  { %3983 = sst [smem:[#allocation7_spill]] %s3953_s4 }
   0x6   :  { %3984 = sst [smem:[#allocation8_spill]] %s3954_s8  ;;  %s3991_s8 = sld [smem:[#allocation6_spill]] }
   0x7   :  { %3985 = sst [smem:[#allocation9_spill]] %s3955_s6  ;;  %s3992_s4 = sld [smem:[#allocation7_spill]] }
   0x8   :  { %3986 = sst [smem:[#allocation10_spill]] %s3956_s7  ;;  %v108_v1 = vld [vmem:[%s3988_s27] sm:$0xff]  ;;  %v109_v3 = vld [vmem:[%s3988_s27 + $0x8] sm:$0xff]  ;;  %s3993_s26 = sld [smem:[#allocation8_spill]] }
   0x9   :  { %3987 = sst [smem:[#allocation11_spill]] %s3957_s9  ;;  %v79_v2 = vld [vmem:[%s3989_s5] sm:$0xff]  ;;  %111 = vperm.xlu0 %3269, %v108_v1   ;;  %v80_v4 = vld [vmem:[%s3989_s5 + $0x8] sm:$0xff]  ;;  %s3990_s9 = sld [smem:[#allocation5_spill]] }
   0xa   :  { %84 = vperm.xlu1 %3270, %v79_v2   ;;  %s3994_s3 = sld [smem:[#allocation9_spill]]  ;;  %s3996_s28 = sld [smem:[#allocation11_spill]] }
   0xb   :  { %s3330_s27 = smov 96   ;;  %s3331_s6 = smov 80  }
   0xc   :  { %v95_v6 = vld [vmem:[%s3991_s8] sm:$0xff]  ;;  %v96_v7 = vld [vmem:[%s3991_s8 + $0x8] sm:$0xff]  ;;  %v97_v15 = vld [vmem:[%s3991_s8 + $0x10] sm:$0xff]  ;;  %s3332_s5 = smov 112   ;;  %s3334_s7 = smov 48  }
   0xd   :  { %v3155_v8 = vpack.c.bf16 %v96_v7, %v95_v6  ;;  %114 = vperm.xlu0 %3269, %v109_v3   ;;  %v98_v16 = vld [vmem:[%s3991_s8 + $0x18] sm:$0xff]  ;;  %v99_v21 = vld [vmem:[%s3991_s8 + $0x20] sm:$0xff]  ;;  %v100_v22 = vld [vmem:[%s3991_s8 + $0x28] sm:$0xff] }
   0xe   :  { %87 = vperm.xlu1 %3270, %v80_v4   ;;  %v3159_v18 = vpack.c.bf16 %v98_v16, %v97_v15  ;;  %v3163_v23 = vpack.c.bf16 %v100_v22, %v99_v21  ;;  %v101_v24 = vld [vmem:[%s3991_s8 + $0x30] sm:$0xff]  ;;  %v102_v25 = vld [vmem:[%s3991_s8 + $0x38] sm:$0xff]  ;;  %v103_v27 = vld [vmem:[%s3991_s8 + $0x40] sm:$0xff]  ;;  %v3583_v21 = vshrl.u32 %v81_v9, 7 }
   0xf   :  { %v122_v5 = vld [vmem:[%s3990_s9] sm:$0x3]  ;;  %v3167_v26 = vpack.c.bf16 %v102_v25, %v101_v24  ;;  %v104_v28 = vld [vmem:[%s3991_s8 + $0x48] sm:$0xff]  ;;  %v105_v30 = vld [vmem:[%s3991_s8 + $0x50] sm:$0xff] }
  0x10   :  { %2926 = vmatprep.subr.msk.mxu0 %vm130_vm0, %v122_v5  ;;  %v3171_v29 = vpack.c.bf16 %v104_v28, %v103_v27  ;;  %v106_v31 = vld [vmem:[%s3991_s8 + $0x58] sm:$0xff]  ;;  %v107_v34 = vld [vmem:[%s3991_s8 + $0x60] sm:$0xf]  ;;  %v348_v54 = vld [vmem:[%s3993_s26 + $0x8] sm:$0xff] }
  0x11   :  { %2927 = vmatpush3.msk.msra.mxu0 %vm130_vm0, %v122_v5  ;;  %v3175_v32 = vpack.c.bf16 %v106_v31, %v105_v30  ;;  %v295_v36 = vld [vmem:[%s3992_s4] sm:$0xff]  ;;  %v349_v55 = vld [vmem:[%s3993_s26 + $0x10] sm:$0xff]  ;;  %v350_v57 = vld [vmem:[%s3993_s26 + $0x18] sm:$0xff]  ;;  %s3995_s4 = sld [smem:[#allocation10_spill]] }
  0x12   :  { %3156 = vmatprep.subr.bf16.mxu0 %v3155_v8  ;;  %v347_v53 = vld [vmem:[%s3993_s26] sm:$0xff]  ;;  %v3183_v58 = vpack.c.bf16 %v350_v57, %v349_v55  ;;  %v781_v57 = vsub.s32 1, %v3583_v21 }
  0x13   :  { %v3179_v56 = vpack.c.bf16 %v348_v54, %v347_v53  ;;  %v2731_v2 = vld [vmem:[%s3994_s3] ss:$0 sm:$0xff] }
  0x15   :  { %3180 = vmatprep.subr.bf16.mxu1 %v3179_v56 }
  0x16   :  { %3182 = vmatpush3.bf16.msra.mxu1 %v3179_v56 }
  0x17   :  { %3184 = vmatprep.subr.bf16.mxu1 %v3183_v58  ;;  %v2732_v4 = vld [vmem:[%s3995_s4] ss:$0 sm:$0xff] }
  0x1a   :  { %3186 = vmatpush3.bf16.msra.mxu1 %v3183_v58 }
  0x1b   :  { %2971 = vmatprep.subr.mxu1 %v3328_v13 }
  0x88   :  { %v112_v11 = vpop.permute.xlu0 %111 }
  0x89   :  { %vm116_vm2 = vcmp.eq.s32.totalorder %v112_v11, %v82_v10  ;;  %v85_v12 = vpop.permute.xlu1 %84 }
  0x8a   :  { %v2723_v14 = vsel %vm116_vm2, 1.0, %v3328_v13  ;;  %vm89_vm3 = vcmp.eq.s32.totalorder %v85_v12, %v82_v10  ;;  %v2733_v12 = vld [vmem:[%s3996_s28] ss:$0 sm:$0xff] }
  0x8b   :  { %2928 = vmatprep.mubr.msk.f32.mxu0 %vm123_vm1, %v2723_v14  ;;  %v2721_v19 = vsel %vm89_vm3, 1.0, %v3328_v13 }
  0x8c   :  { %v115_v17 = vpop.permute.xlu0 %114 }
  0x8d   :  { %vm117_vm4 = vcmp.eq.s32.totalorder %v115_v17, %v82_v10  ;;  %v88_v33 = vpop.permute.xlu1 %87 }
  0x8e   :  { %v2724_v20 = vsel %vm117_vm4, 1.0, %v3328_v13  ;;  %vm90_vm7 = vcmp.eq.s32.totalorder %v88_v33, %v82_v10 }
  0x8f   :  { %2929 = vmatmul.mubr.msk.f32.vlgmr.msra.gmra.mrb[0].mxu0 %vm123_vm1, %v2724_v20  ;;  %v2722_v35 = vsel %vm90_vm7, 1.0, %v3328_v13 }
  0x90   :  { %3158 = vmatpush3.bf16.msra.mxu0 %v3155_v8  ;;  %2957 = vmatprep.mubr.msk.f32.mxu0 %vm209_vm5, %v2721_v19  ;;  %v298_v19 = vld [vmem:[%s3958_s2] sm:$0x3]  ;;  %s3333_s2 = smov 64  }
  0x91   :  { %3160 = vmatprep.subr.bf16.mxu0 %v3159_v18  ;;  %v299_v20 = vsub.f32 1.0, %v298_v19 }
  0x93   :  { %v3585_v22 = vmul.f32 -10000.0, %v299_v20 }
  0x94   :  { %3162 = vmatpush3.bf16.msra.mxu0 %v3159_v18 }
  0x95   :  { %3164 = vmatprep.subr.bf16.mxu0 %v3163_v23 }
  0x98   :  { %3166 = vmatpush3.bf16.msra.mxu0 %v3163_v23  ;;  %v441_v23 = vsub.s32 0, %v3583_v21 }
  0x99   :  { %3168 = vmatprep.subr.bf16.mxu0 %v3167_v26 }
  0x9a   :  { %v442_v24 = vrot.slane %v3585_v22, %v441_v23 }
  0x9c   :  { %3170 = vmatpush3.bf16.msra.mxu0 %v3167_v26 }
  0x9d   :  { %3172 = vmatprep.subr.bf16.mxu0 %v3171_v29 }
  0xa0   :  { %3174 = vmatpush3.bf16.msra.mxu0 %v3171_v29 }
  0xa1   :  { %3176 = vmatprep.subr.bf16.mxu0 %v3175_v32 }
  0xa4   :  { %3178 = vmatpush3.bf16.msra.mxu0 %v3175_v32 }
  0xa5   :  { %2955 = vmatprep.subr.msk.mxu0 %vm216_vm6, %v107_v34 }
  0xa8   :  { %2956 = vmatpush3.msk.msra.mxu0 %vm216_vm6, %v107_v34 }
  0xa9   :  { %2958 = vmatmul.mubr.msk.f32.vlgmr.msra.gmra.mrb[0].mxu0 %vm209_vm5, %v2722_v35  ;;  %2996 = vmatprep.subr.mxu0 %v3328_v13 }
  0xaa   :  { %2998 = vmatprep.mubr.msk.f32.mxu0 %vm3329_vm9, %v3328_v13 }
 0x17c   :  { %v2959_v37 = vpop.f32.mrb[0].mxu0 }
 0x17d   :  { %v297_v38 = vadd.f32 %v2959_v37, %v295_v36  ;;  %v286_v39 = vpop.f32.mrb[1].mxu0 }
 0x17e   :  { %v296_v40 = vadd.f32 %v295_v36, %v286_v39 }
 0x17f   :  { %v307_v41 = vsel %vm303_vm8, %v297_v38, 0.0 }
 0x180   :  { %308 = vadd.xlane.f32.xlu1 %v307_v41  ;;  %v304_v42 = vsel %vm303_vm8, %v296_v40, 0.0 }
 0x181   :  { %305 = vadd.xlane.f32.xlu0 %v304_v42 }
 0x20d   :  { %v309_v43 = vpop.xlane.xlu1 %308 }
 0x20e   :  { %v312_v44 = vmul.f32 0.03125, %v309_v43  ;;  %v306_v45 = vpop.xlane.xlu0 %305 }
 0x20f   :  { %v311_v46 = vmul.f32 0.03125, %v306_v45 }
 0x210   :  { %v314_v47 = vsub.f32 %v297_v38, %v312_v44 }
 0x211   :  { %v313_v48 = vsub.f32 %v296_v40, %v311_v46 }
 0x212   :  { %v316_v51 = vmul.f32 %v314_v47, %v314_v47 }
 0x213   :  { %v315_v49 = vmul.f32 %v313_v48, %v313_v48 }
 0x214   :  { %v320_v52 = vsel %vm303_vm8, %v316_v51, 0.0 }
 0x215   :  { %v317_v50 = vsel %vm303_vm8, %v315_v49, 0.0 }
 0x216   :  { %318 = vadd.xlane.f32.xlu0 %v317_v50 }
 0x21a   :  { %321 = vadd.xlane.f32.xlu0 %v320_v52 }
 0x2a3   :  { %v319_v59 = vpop.xlane.xlu0 %318 }
 0x2a4   :  { %v323_v60 = vmul.f32 0.03125, %v319_v59 }
 0x2a6   :  { %v325_v61 = vadd.f32 1e-12, %v323_v60  ;;  %v782_v60 = vrot.slane %v3585_v22, %v781_v57 }
 0x2a7   :  { %v322_v62 = vpop.xlane.xlu0 %321 }
 0x2a8   :  { %3271 = vrsqrt.f32 %v325_v61  ;;  %v324_v63 = vmul.f32 0.03125, %v322_v62 }
 0x2aa   :  { %v326_v0 = vadd.f32 1e-12, %v324_v63 }
 0x2ac   :  { %3273 = vrsqrt.f32 %v326_v0 }
 0x2b2   :  { %v3272_v1 = vpop.eup %3271 }
 0x2b3   :  { %v329_v3 = vmul.f32 %v3272_v1, %v313_v48 }
 0x2b5   :  { %v337_v5 = vmul.f32 %v2731_v2, %v329_v3 }
 0x2b6   :  { %v3274_v6 = vpop.eup %3273 }
 0x2b7   :  { %v330_v7 = vmul.f32 %v3274_v6, %v314_v47  ;;  %v3554_v8 = vadd.f32 %v2732_v4, %v337_v5 }
 0x2b9   :  { %v338_v10 = vmul.f32 %v2731_v2, %v330_v7  ;;  %2968 = vmatprep.mubr.msk.f32.mxu1 %vm303_vm8, %v3554_v8 }
 0x2bb   :  { %v3558_v11 = vadd.f32 %v2732_v4, %v338_v10 }
 0x2bd   :  { %2969 = vmatmul.mubr.msk.f32.vlgmr.msra.gmra.mrb[0].mxu1 %vm303_vm8, %v3558_v11 }
 0x2be   :  { %2973 = vmatprep.mubr.msk.f32.mxu1 %vm3329_vm9, %v3328_v13 }
 0x390   :  { %v2970_v14 = vpop.f32.mrb[0].mxu1 }
 0x391   :  { %v3569_v15 = vadd.f32 %v2970_v14, %v2733_v12  ;;  %v430_v16 = vpop.f32.mrb[1].mxu1 }
 0x392   :  { %v431_v17 = vadd.f32 %v2733_v12, %v430_v16 }
 0x394   :  { %444 = vrot.lane.b32.xlu1 %v431_v17, %s3330_s27 }
 0x398   :  { %611 = vrot.lane.b32.xlu1 %v431_v17, %s3331_s6 }
 0x39c   :  { %609 = vrot.lane.b32.xlu1 %v431_v17, %s3332_s5 }
 0x406   :  { %v445_v18 = vpop.permute.xlu1 %444 }
 0x407   :  { %2972 = vmatpush3.xpose.msk.msra.mxu1 %vm446_vm10, %v445_v18 }
 0x408   :  { %2976 = vmatprep.subr.mxu1 %v3328_v13 }
 0x40a   :  { %2974 = vmatmul.mubr.msk.f32.vlgmr.msra.gmra.mrb[2].mxu1 %vm446_vm10, %v431_v17  ;;  %v612_v36 = vpop.permute.xlu1 %611 }
 0x40b   :  { %2978 = vmatprep.mubr.msk.f32.mxu1 %vm3329_vm9, %v3328_v13 }
 0x40e   :  { %v610_v38 = vpop.permute.xlu1 %609 }
 0x4dd   :  { %v517_v25 = vpop.f32.mrb[2].mxu1 }
 0x4de   :  { %v518_v26 = vadd.f32 %v517_v25, %v442_v24  ;;  %v2975_v27 = vpop.f32.mrb[3].mxu1 }
 0x4e0   :  { %v522_v28 = vsel %vm521_vm11, %v518_v26, -inf }
 0x4e1   :  { %523 = vmax.xlane.f32.xlu0 %v522_v28 }
 0x56e   :  { %v524_v29 = vpop.xlane.xlu0 %523 }
 0x56f   :  { %v525_v30 = vsub.f32 %v518_v26, %v524_v29 }
 0x571   :  { %v526_v31 = vmul.f32 1.442695, %v525_v30 }
 0x573   :  { %3275 = vpow2.f32 %v526_v31  ;;  %v1118_v31 = vld [vmem:[%s3959_s10 + $0x8] sm:$0xff] }
 0x57d   :  { %v3276_v32 = vpop.eup %3275 }
 0x57e   :  { %v528_v9 = vsel %vm521_vm11, %v3276_v32, 0.0 }
 0x57f   :  { %529 = vadd.xlane.f32.xlu0 %v528_v9 }
 0x595   :  { %533 = vrot.lane.b32.xlu0 %v431_v17, %s3333_s2 }
 0x60c   :  { %v530_v33 = vpop.xlane.xlu0 %529 }
 0x60d   :  { %3277 = vrcp.f32 %v530_v33  ;;  %v1120_v33 = vld [vmem:[%s3959_s10 + $0x18] sm:$0xff] }
 0x610   :  { %v534_v34 = vpop.permute.xlu0 %533 }
 0x611   :  { %2977 = vmatpush3.msra.mxu1 %v534_v34 }
 0x612   :  { %2981 = vmatprep.subr.mxu1 %v3328_v13 }
 0x617   :  { %v3278_v35 = vpop.eup %3277 }
 0x618   :  { %v532_v37 = vmul.f32 %v3278_v35, %v3276_v32  ;;  %v1119_v32 = vld [vmem:[%s3959_s10 + $0x10] sm:$0xff] }
 0x619   :  { %v3191_v34 = vpack.c.bf16 %v1120_v33, %v1119_v32 }
 0x61a   :  { %2979 = vmatmul.mubr.msk.f32.vlgmr.msra.gmra.mrb[4].mxu1 %vm521_vm11, %v532_v37 }
 0x61b   :  { %2982 = vmatpush3.xpose.msk.msra.mxu1 %vm446_vm10, %v612_v36  ;;  %2983 = vmatprep.mubr.msk.f32.mxu1 %vm3329_vm9, %v3328_v13 }
 0x61c   :  { %2986 = vmatprep.subr.mxu1 %v3328_v13 }
 0x61e   :  { %2984 = vmatmul.mubr.msk.f32.vlgmr.msra.gmra.mrb[6].mxu1 %vm446_vm10, %v610_v38 }
 0x61f   :  { %2988 = vmatprep.mubr.msk.f32.mxu1 %vm3329_vm9, %v3328_v13 }
 0x6ed   :  { %v3601_v39 = vpop.f32.mrb[4].mxu1 }
 0x6ee   :  { %v2980_v40 = vpop.f32.mrb[5].mxu1 }
 0x6f1   :  { %v683_v41 = vpop.f32.mrb[6].mxu1 }
 0x6f2   :  { %v684_v42 = vadd.f32 %v683_v41, %v442_v24  ;;  %v2985_v43 = vpop.f32.mrb[7].mxu1  ;;  %v2748_v41 = vld [vmem:[%s3960_s11] ss:$0 sm:$0xff] }
 0x6f4   :  { %v687_v44 = vsel %vm521_vm11, %v684_v42, -inf }
 0x6f5   :  { %688 = vmax.xlane.f32.xlu1 %v687_v44 }
 0x706   :  { %698 = vrot.lane.b32.xlu1 %v431_v17, %s3334_s7 }
 0x70a   :  { %949 = vrot.lane.b32.xlu1 %v3569_v15, %s3331_s6 }
 0x70e   :  { %947 = vrot.lane.b32.xlu1 %v3569_v15, %s3332_s5 }
 0x782   :  { %v689_v45 = vpop.xlane.xlu1 %688 }
 0x783   :  { %v690_v46 = vsub.f32 %v684_v42, %v689_v45 }
 0x785   :  { %v691_v47 = vmul.f32 1.442695, %v690_v46 }
 0x786   :  { %v699_v48 = vpop.permute.xlu1 %698 }
 0x787   :  { %3279 = vpow2.f32 %v691_v47  ;;  %2987 = vmatpush3.msra.mxu1 %v699_v48 }
 0x788   :  { %2991 = vmatprep.subr.mxu1 %v3328_v13 }
 0x78a   :  { %v950_v55 = vpop.permute.xlu1 %949 }
 0x78e   :  { %v948_v56 = vpop.permute.xlu1 %947 }
 0x791   :  { %v3280_v49 = vpop.eup %3279 }
 0x792   :  { %v693_v50 = vsel %vm521_vm11, %v3280_v49, 0.0 }
 0x793   :  { %694 = vadd.xlane.f32.xlu0 %v693_v50 }
 0x7a9   :  { %784 = vrot.lane.b32.xlu0 %v3569_v15, %s3330_s27 }
 0x820   :  { %v695_v51 = vpop.xlane.xlu0 %694 }
 0x821   :  { %3281 = vrcp.f32 %v695_v51 }
 0x824   :  { %v785_v54 = vpop.permute.xlu0 %784 }
 0x82b   :  { %v3282_v52 = vpop.eup %3281 }
 0x82c   :  { %v697_v53 = vmul.f32 %v3282_v52, %v3280_v49 }
 0x82e   :  { %2989 = vmatmul.mubr.msk.f32.vlgmr.msra.gmra.mrb[8].mxu1 %vm521_vm11, %v697_v53 }
 0x82f   :  { %2992 = vmatpush3.xpose.msk.msra.mxu1 %vm446_vm10, %v785_v54  ;;  %2993 = vmatprep.mubr.msk.f32.mxu1 %vm3329_vm9, %v3328_v13 }
 0x830   :  { %3001 = vmatprep.subr.mxu1 %v3328_v13 }
 0x832   :  { %2994 = vmatmul.mubr.msk.f32.vlgmr.msra.gmra.mrb[10].mxu1 %vm446_vm10, %v3569_v15 }
 0x833   :  { %3002 = vmatpush3.xpose.msk.msra.mxu1 %vm446_vm10, %v950_v55  ;;  %3003 = vmatprep.mubr.msk.f32.mxu1 %vm3329_vm9, %v3328_v13 }
 0x836   :  { %3004 = vmatmul.mubr.msk.f32.vlgmr.msra.gmra.mrb[12].mxu1 %vm446_vm10, %v948_v56 }
 0x901   :  { %v770_v58 = vpop.f32.mrb[8].mxu1 }
 0x902   :  { %v2990_v59 = vpop.f32.mrb[9].mxu1 }
 0x903   :  { %v1256_v59 = vld [vmem:[%s3961_s14 + $0x8] sm:$0xff] }
 0x905   :  { %v856_v61 = vpop.f32.mrb[10].mxu1 }
 0x906   :  { %v857_v62 = vadd.f32 %v856_v61, %v782_v60  ;;  %v2995_v63 = vpop.f32.mrb[11].mxu1  ;;  %v1257_v61 = vld [vmem:[%s3961_s14 + $0x10] sm:$0xff] }
 0x908   :  { %v860_v0 = vsel %vm521_vm11, %v857_v62, -inf }
 0x909   :  { %861 = vmax.xlane.f32.xlu0 %v860_v0  ;;  %v1021_v1 = vpop.f32.mrb[12].mxu1 }
 0x90a   :  { %v1022_v2 = vadd.f32 %v1021_v1, %v782_v60  ;;  %v3005_v3 = vpop.f32.mrb[13].mxu1 }
 0x90c   :  { %v1025_v4 = vsel %vm521_vm11, %v1022_v2, -inf }
 0x90d   :  { %1026 = vmax.xlane.f32.xlu1 %v1025_v4 }
 0x91e   :  { %871 = vrot.lane.b32.xlu1 %v3569_v15, %s3333_s2 }
 0x922   :  { %775 = vrot.lane.b32.xlu1 %v770_v58, %s3335_s30 }
 0x996   :  { %v862_v5 = vpop.xlane.xlu0 %861 }
 0x997   :  { %v863_v6 = vsub.f32 %v857_v62, %v862_v5  ;;  %v1258_v62 = vld [vmem:[%s3961_s14 + $0x18] sm:$0xff] }
 0x998   :  { %v3199_v63 = vpack.c.bf16 %v1258_v62, %v1257_v61 }
 0x999   :  { %v864_v7 = vmul.f32 1.442695, %v863_v6 }
 0x99a   :  { %v1027_v10 = vpop.xlane.xlu1 %1026 }
 0x99b   :  { %3283 = vpow2.f32 %v864_v7  ;;  %v1028_v12 = vsub.f32 %v1022_v2, %v1027_v10  ;;  %v2751_v7 = vld [vmem:[%s3962_s12] ss:$0 sm:$0xff] }
 0x99d   :  { %v1029_v14 = vmul.f32 1.442695, %v1028_v12  ;;  %v2752_v12 = vld [vmem:[%s3963_s13] ss:$0 sm:$0xff] }
 0x99e   :  { %v872_v16 = vpop.permute.xlu1 %871 }
 0x99f   :  { %3285 = vpow2.f32 %v1029_v14  ;;  %2997 = vmatpush3.msra.mxu0 %v872_v16 }
 0x9a0   :  { %3006 = vmatprep.subr.mxu0 %v3328_v13 }
 0x9a2   :  { %v776_v17 = vpop.permute.xlu1 %775 }
 0x9a3   :  { %v778_v18 = vsel %vm446_vm10, %v3601_v39, %v776_v17 }
 0x9a4   :  { %3019 = vmatprep.mubr.msk.f32.mxu1 %vm303_vm8, %v778_v18 }
 0x9a5   :  { %v3284_v19 = vpop.eup %3283 }
 0x9a6   :  { %v866_v20 = vsel %vm521_vm11, %v3284_v19, 0.0 }
 0x9a7   :  { %867 = vadd.xlane.f32.xlu0 %v866_v20 }
 0x9a9   :  { %v3286_v21 = vpop.eup %3285 }
 0x9aa   :  { %v1031_v23 = vsel %vm521_vm11, %v3286_v21, 0.0 }
 0x9ab   :  { %1032 = vadd.xlane.f32.xlu0 %v1031_v23  ;;  %v1358_v23 = vld [vmem:[%s3964_s16 + $0x8] sm:$0xff] }
 0x9c1   :  { %1036 = vrot.lane.b32.xlu0 %v3569_v15, %s3334_s7  ;;  %v1117_v15 = vld [vmem:[%s3959_s10] sm:$0xff] }
 0x9c2   :  { %v3187_v9 = vpack.c.bf16 %v1118_v31, %v1117_v15  ;;  %v1363_v15 = vld [vmem:[%s3964_s16 + $0x30] sm:$0xff]  ;;  %v1364_v31 = vld [vmem:[%s3964_s16 + $0x38] sm:$0xff] }
 0x9c3   :  { %v3215_v32 = vpack.c.bf16 %v1364_v31, %v1363_v15 }
 0x9c4   :  { %3188 = vmatprep.subr.bf16.mxu1 %v3187_v9 }
 0x9c5   :  { %3190 = vmatpush3.bf16.msra.mxu1 %v3187_v9  ;;  %v2753_v9 = vld [vmem:[%s3965_s15] ss:$0 sm:$0xff] }
 0x9c6   :  { %3192 = vmatprep.subr.bf16.mxu1 %v3191_v34 }
 0x9c9   :  { %3194 = vmatpush3.bf16.msra.mxu1 %v3191_v34 }
 0xa34   :  { %v868_v24 = vpop.xlane.xlu0 %867 }
 0xa35   :  { %3287 = vrcp.f32 %v868_v24 }
 0xa38   :  { %v1033_v25 = vpop.xlane.xlu0 %1032 }
 0xa39   :  { %3289 = vrcp.f32 %v1033_v25  ;;  %v1359_v25 = vld [vmem:[%s3964_s16 + $0x10] sm:$0xff] }
 0xa3c   :  { %v1037_v28 = vpop.permute.xlu0 %1036 }
 0xa3f   :  { %v3288_v26 = vpop.eup %3287 }
 0xa40   :  { %v870_v27 = vmul.f32 %v3288_v26, %v3284_v19  ;;  %v1360_v26 = vld [vmem:[%s3964_s16 + $0x18] sm:$0xff] }
 0xa42   :  { %2999 = vmatmul.mubr.msk.f32.vlgmr.msra.gmra.mrb[2].mxu0 %vm521_vm11, %v870_v27  ;;  %v3207_v27 = vpack.c.bf16 %v1360_v26, %v1359_v25 }
 0xa43   :  { %v3290_v29 = vpop.eup %3289  ;;  %3007 = vmatpush3.msra.mxu0 %v1037_v28  ;;  %3008 = vmatprep.mubr.msk.f32.mxu0 %vm3329_vm9, %v3328_v13  ;;  %v1361_v28 = vld [vmem:[%s3964_s16 + $0x20] sm:$0xff] }
 0xa44   :  { %v1035_v30 = vmul.f32 %v3290_v29, %v3286_v21  ;;  %v1357_v21 = vld [vmem:[%s3964_s16] sm:$0xff]  ;;  %v1362_v29 = vld [vmem:[%s3964_s16 + $0x28] sm:$0xff] }
 0xa45   :  { %v3203_v24 = vpack.c.bf16 %v1358_v23, %v1357_v21  ;;  %v2760_v21 = vld [vmem:[%s3968_s19] ss:$0 sm:$0xff] }
 0xa46   :  { %3009 = vmatmul.mubr.msk.f32.vlgmr.msra.gmra.mrb[4].mxu0 %vm521_vm11, %v1035_v30  ;;  %v3211_v30 = vpack.c.bf16 %v1362_v29, %v1361_v28 }
 0xa47   :  { %3204 = vmatprep.subr.bf16.mxu1 %v3203_v24 }
 0xb15   :  { %v943_v35 = vpop.f32.mrb[2].mxu0 }
 0xb16   :  { %v3000_v36 = vpop.f32.mrb[3].mxu0 }
 0xb19   :  { %v1108_v37 = vpop.f32.mrb[4].mxu0 }
 0xb1a   :  { %1113 = vrot.lane.b32.xlu1 %v1108_v37, %s3335_s30  ;;  %v3010_v38 = vpop.f32.mrb[5].mxu0 }
 0xb8c   :  { %v1114_v39 = vpop.permute.xlu1 %1113 }
 0xb8d   :  { %v1116_v40 = vsel %vm446_vm10, %v943_v35, %v1114_v39 }
 0xb8e   :  { %3020 = vmatmul.mubr.msk.f32.vlgmr.msra.gmra.mrb[14].mxu1 %vm303_vm8, %v1116_v40 }
 0xb8f   :  { %3206 = vmatpush3.bf16.msra.mxu1 %v3203_v24 }
 0xb90   :  { %3208 = vmatprep.subr.bf16.mxu1 %v3207_v27 }
 0xb93   :  { %3210 = vmatpush3.bf16.msra.mxu1 %v3207_v27 }
 0xb94   :  { %3212 = vmatprep.subr.bf16.mxu1 %v3211_v30 }
 0xb97   :  { %3214 = vmatpush3.bf16.msra.mxu1 %v3211_v30  ;;  %v2766_v30 = vld [vmem:[%s3996_s28 + $0x1] ss:$0 sm:$0xff] }
 0xb98   :  { %3216 = vmatprep.subr.bf16.mxu1 %v3215_v32 }
 0xb9b   :  { %3218 = vmatpush3.bf16.msra.mxu1 %v3215_v32 }
 0xb9c   :  { %3073 = vmatprep.subr.mxu1 %v3328_v13 }
 0xc61   :  { %v3021_v42 = vpop.f32.mrb[14].mxu1 }
 0xc62   :  { %v1206_v43 = vadd.f32 %v3021_v42, %v2748_v41  ;;  %v1200_v44 = vpop.f32.mrb[15].mxu1 }
 0xc63   :  { %v1201_v45 = vadd.f32 %v2748_v41, %v1200_v44 }
 0xc64   :  { %v1210_v46 = vadd.f32 %v1206_v43, %v3558_v11 }
 0xc65   :  { %v1209_v47 = vadd.f32 %v1201_v45, %v3554_v8  ;;  %v1255_v8 = vld [vmem:[%s3961_s14] sm:$0xff] }
 0xc66   :  { %v1216_v48 = vsel %vm303_vm8, %v1210_v46, 0.0  ;;  %v3195_v60 = vpack.c.bf16 %v1256_v59, %v1255_v8 }
 0xc67   :  { %1217 = vadd.xlane.f32.xlu1 %v1216_v48  ;;  %v1213_v49 = vsel %vm303_vm8, %v1209_v47, 0.0 }
 0xc68   :  { %1214 = vadd.xlane.f32.xlu0 %v1213_v49  ;;  %3196 = vmatprep.subr.bf16.mxu0 %v3195_v60 }
 0xc69   :  { %3198 = vmatpush3.bf16.msra.mxu0 %v3195_v60 }
 0xc6a   :  { %3200 = vmatprep.subr.bf16.mxu0 %v3199_v63 }
 0xc6d   :  { %3202 = vmatpush3.bf16.msra.mxu0 %v3199_v63 }
 0xcf4   :  { %v1218_v50 = vpop.xlane.xlu1 %1217 }
 0xcf5   :  { %v1220_v51 = vmul.f32 0.03125, %v1218_v50  ;;  %v1215_v52 = vpop.xlane.xlu0 %1214 }
 0xcf6   :  { %v1219_v53 = vmul.f32 0.03125, %v1215_v52 }
 0xcf7   :  { %v1222_v54 = vsub.f32 %v1210_v46, %v1220_v51 }
 0xcf8   :  { %v1221_v55 = vsub.f32 %v1209_v47, %v1219_v53  ;;  %v2756_v47 = vld [vmem:[%s3966_s17] ss:$0 sm:$0xff] }
 0xcf9   :  { %v1224_v58 = vmul.f32 %v1222_v54, %v1222_v54 }
 0xcfa   :  { %v1223_v56 = vmul.f32 %v1221_v55, %v1221_v55 }
 0xcfb   :  { %v1228_v11 = vsel %vm303_vm8, %v1224_v58, 0.0 }
 0xcfc   :  { %v1225_v57 = vsel %vm303_vm8, %v1223_v56, 0.0 }
 0xcfd   :  { %1226 = vadd.xlane.f32.xlu0 %v1225_v57 }
 0xd01   :  { %1229 = vadd.xlane.f32.xlu0 %v1228_v11 }
 0xd8a   :  { %v1227_v0 = vpop.xlane.xlu0 %1226 }
 0xd8b   :  { %v1231_v1 = vmul.f32 0.03125, %v1227_v0  ;;  %v2761_v0 = vld [vmem:[%s3993_s26 + $0x20] sm:$0xff] }
 0xd8d   :  { %v1233_v2 = vadd.f32 1e-12, %v1231_v1  ;;  %v2762_v1 = vld [vmem:[%s3993_s26 + $0x28] sm:$0xff] }
 0xd8e   :  { %v1230_v3 = vpop.xlane.xlu0 %1229 }
 0xd8f   :  { %3291 = vrsqrt.f32 %v1233_v2  ;;  %v1232_v4 = vmul.f32 0.03125, %v1230_v3  ;;  %v3219_v2 = vpack.c.bf16 %v2762_v1, %v2761_v0  ;;  %v2763_v3 = vld [vmem:[%s3993_s26 + $0x30] sm:$0xff] }
 0xd91   :  { %v1234_v5 = vadd.f32 1e-12, %v1232_v4  ;;  %v2764_v4 = vld [vmem:[%s3993_s26 + $0x38] sm:$0xff]  ;;  %3220 = vmatprep.subr.bf16.mxu0 %v3219_v2 }
 0xd93   :  { %3293 = vrsqrt.f32 %v1234_v5  ;;  %v3223_v5 = vpack.c.bf16 %v2764_v4, %v2763_v3 }
 0xd99   :  { %v3292_v6 = vpop.eup %3291 }
 0xd9a   :  { %v1237_v10 = vmul.f32 %v3292_v6, %v1221_v55 }
 0xd9c   :  { %v1245_v14 = vmul.f32 %v2751_v7, %v1237_v10 }
 0xd9d   :  { %v3294_v16 = vpop.eup %3293 }
 0xd9e   :  { %v1238_v17 = vmul.f32 %v3294_v16, %v1222_v54  ;;  %v1253_v18 = vadd.f32 %v2752_v12, %v1245_v14 }
 0xda0   :  { %v1246_v19 = vmul.f32 %v2751_v7, %v1238_v17  ;;  %3030 = vmatprep.mubr.msk.f32.mxu0 %vm303_vm8, %v1253_v18 }
 0xda2   :  { %v1254_v20 = vadd.f32 %v2752_v12, %v1246_v19 }
 0xda4   :  { %3031 = vmatmul.mubr.msk.f32.vlgmr.msra.gmra.mrb[6].mxu0 %vm303_vm8, %v1254_v20 }
 0xda5   :  { %3222 = vmatpush3.bf16.msra.mxu0 %v3219_v2 }
 0xda6   :  { %3224 = vmatprep.subr.bf16.mxu0 %v3223_v5 }
 0xda9   :  { %3226 = vmatpush3.bf16.msra.mxu0 %v3223_v5 }
 0xdaa   :  { %3063 = vmatprep.subr.mxu0 %v3328_v13 }
 0xe77   :  { %v3032_v33 = vpop.f32.mrb[6].mxu0 }
 0xe78   :  { %v1344_v34 = vadd.f32 %v3032_v33, %v2753_v9  ;;  %v1338_v35 = vpop.f32.mrb[7].mxu0 }
 0xe79   :  { %v1339_v36 = vadd.f32 %v2753_v9, %v1338_v35 }
 0xe7a   :  { %v1350_v37 = vmul.f32 0.70710677, %v1344_v34  ;;  %v1348_v44 = vmul.f32 0.5, %v1344_v34 }
 0xe7b   :  { %v1349_v38 = vmul.f32 0.70710677, %v1339_v36  ;;  %v1347_v42 = vmul.f32 0.5, %v1339_v36 }
 0xe7c   :  { %3295 = verf.f32 %v1350_v37 }
 0xe7d   :  { %3297 = verf.f32 %v1349_v38 }
 0xe86   :  { %v3296_v39 = vpop.eup %3295 }
 0xe87   :  { %v3298_v40 = vpop.eup %3297  ;;  %v1354_v41 = vadd.f32 1.0, %v3296_v39 }
 0xe88   :  { %v1353_v43 = vadd.f32 1.0, %v3298_v40 }
 0xe89   :  { %v1356_v46 = vmul.f32 %v1354_v41, %v1348_v44 }
 0xe8a   :  { %v1355_v45 = vmul.f32 %v1353_v43, %v1347_v42 }
 0xe8c   :  { %3049 = vmatprep.mubr.msk.f32.mxu1 %vm1372_vm12, %v1355_v45 }
 0xe8d   :  { %3050 = vmatmul.mubr.msk.f32.vlgmr.msra.gmra.mrb[16].mxu1 %vm1372_vm12, %v1356_v46 }
 0xe8e   :  { %3075 = vmatprep.mubr.msk.f32.mxu1 %vm3329_vm9, %v3328_v13 }
 0xf60   :  { %v3051_v48 = vpop.f32.mrb[16].mxu1 }
 0xf61   :  { %v1451_v49 = vadd.f32 %v3051_v48, %v2756_v47  ;;  %v1445_v50 = vpop.f32.mrb[17].mxu1 }
 0xf62   :  { %v1446_v51 = vadd.f32 %v2756_v47, %v1445_v50  ;;  %v1933_v47 = vrot.slane %v3585_v22, 1 }
 0xf63   :  { %v1455_v52 = vadd.f32 %v1451_v49, %v1254_v20 }
 0xf64   :  { %v1454_v53 = vadd.f32 %v1446_v51, %v1253_v18  ;;  %v2759_v18 = vld [vmem:[%s3967_s18] ss:$0 sm:$0xff] }
 0xf65   :  { %v1461_v54 = vsel %vm303_vm8, %v1455_v52, 0.0 }
 0xf66   :  { %1462 = vadd.xlane.f32.xlu0 %v1461_v54  ;;  %v1458_v55 = vsel %vm303_vm8, %v1454_v53, 0.0 }
 0xf67   :  { %1459 = vadd.xlane.f32.xlu1 %v1458_v55 }
 0xff3   :  { %v1463_v56 = vpop.xlane.xlu0 %1462 }
 0xff4   :  { %v1465_v57 = vmul.f32 0.03125, %v1463_v56  ;;  %v1460_v58 = vpop.xlane.xlu1 %1459 }
 0xff5   :  { %v1464_v11 = vmul.f32 0.03125, %v1460_v58 }
 0xff6   :  { %v1467_v8 = vsub.f32 %v1455_v52, %v1465_v57 }
 0xff7   :  { %v1466_v59 = vsub.f32 %v1454_v53, %v1464_v11 }
 0xff8   :  { %v1469_v60 = vmul.f32 %v1467_v8, %v1467_v8 }
 0xff9   :  { %v1468_v61 = vmul.f32 %v1466_v59, %v1466_v59 }
 0xffa   :  { %v1473_v62 = vsel %vm303_vm8, %v1469_v60, 0.0 }
 0xffb   :  { %1474 = vadd.xlane.f32.xlu0 %v1473_v62  ;;  %v1470_v63 = vsel %vm303_vm8, %v1468_v61, 0.0 }
 0xffc   :  { %1471 = vadd.xlane.f32.xlu1 %v1470_v63 }
0x1088   :  { %v1475_v6 = vpop.xlane.xlu0 %1474 }
0x1089   :  { %v1477_v7 = vmul.f32 0.03125, %v1475_v6  ;;  %v1472_v10 = vpop.xlane.xlu1 %1471 }
0x108a   :  { %v1476_v12 = vmul.f32 0.03125, %v1472_v10 }
0x108b   :  { %v1479_v14 = vadd.f32 1e-12, %v1477_v7 }
0x108c   :  { %v1478_v16 = vadd.f32 1e-12, %v1476_v12 }
0x108d   :  { %3299 = vrsqrt.f32 %v1479_v14 }
0x108e   :  { %3301 = vrsqrt.f32 %v1478_v16 }
0x1097   :  { %v3300_v17 = vpop.eup %3299 }
0x1098   :  { %v3302_v19 = vpop.eup %3301  ;;  %v1483_v20 = vmul.f32 %v3300_v17, %v1467_v8 }
0x1099   :  { %v1482_v23 = vmul.f32 %v3302_v19, %v1466_v59 }
0x109a   :  { %v1491_v24 = vmul.f32 %v2759_v18, %v1483_v20 }
0x109b   :  { %v1490_v25 = vmul.f32 %v2759_v18, %v1482_v23 }
0x109c   :  { %v1499_v26 = vadd.f32 %v2760_v21, %v1491_v24 }
0x109d   :  { %v1498_v27 = vadd.f32 %v2760_v21, %v1490_v25 }
0x109e   :  { %v2271_v28 = vrot.slane %v1499_v26, 7 }
0x109f   :  { %3060 = vmatprep.mubr.msk.f32.mxu0 %vm303_vm8, %v1498_v27 }
0x10a0   :  { %3061 = vmatmul.mubr.msk.f32.vlgmr.msra.gmra.mrb[8].mxu0 %vm303_vm8, %v1499_v26  ;;  %v3748_v29 = vsel %vm2269_vm13, %v1498_v27, %v2271_v28 }
0x10a1   :  { %3065 = vmatprep.mubr.msk.f32.mxu0 %vm3329_vm9, %v3328_v13 }
0x1173   :  { %v3062_v15 = vpop.f32.mrb[8].mxu0 }
0x1174   :  { %v1585_v31 = vpop.f32.mrb[9].mxu0  ;;  %v3761_v9 = vadd.f32 %v3062_v15, %v2766_v30 }
0x1175   :  { %v3755_v32 = vadd.f32 %v2766_v30, %v1585_v31  ;;  %v2781_v31 = vld [vmem:[%s3959_s10 + $0x20] sm:$0xff] }
0x1177   :  { %1761 = vrot.lane.b32.xlu0 %v3755_v32, %s3331_s6  ;;  %1595 = vrot.lane.b32.xlu1 %v3755_v32, %s3330_s27 }
0x117b   :  { %2098 = vrot.lane.b32.xlu0 %v3761_v9, %s3331_s6  ;;  %1759 = vrot.lane.b32.xlu1 %v3755_v32, %s3332_s5 }
0x117f   :  { %1930 = vrot.lane.b32.xlu1 %v3761_v9, %s3330_s27 }
0x1183   :  { %2096 = vrot.lane.b32.xlu1 %v3761_v9, %s3332_s5 }
0x11e9   :  { %v1762_v33 = vpop.permute.xlu0 %1761  ;;  %v1596_v34 = vpop.permute.xlu1 %1595 }
0x11ea   :  { %3064 = vmatpush3.xpose.msk.msra.mxu0 %vm446_vm10, %v1596_v34  ;;  %3074 = vmatpush3.xpose.msk.msra.mxu1 %vm446_vm10, %v1762_v33  ;;  %v2783_v34 = vld [vmem:[%s3959_s10 + $0x30] sm:$0xff] }
0x11eb   :  { %3083 = vmatprep.subr.mxu1 %v3328_v13  ;;  %3068 = vmatprep.subr.mxu0 %v3328_v13 }
0x11ed   :  { %3066 = vmatmul.mubr.msk.f32.vlgmr.msra.gmra.mrb[10].mxu0 %vm446_vm10, %v3755_v32  ;;  %v1760_v35 = vpop.permute.xlu1 %1759  ;;  %v2099_v37 = vpop.permute.xlu0 %2098 }
0x11ee   :  { %3076 = vmatmul.mubr.msk.f32.vlgmr.msra.gmra.mrb[18].mxu1 %vm446_vm10, %v1760_v35  ;;  %3070 = vmatprep.mubr.msk.f32.mxu0 %vm3329_vm9, %v3328_v13  ;;  %v2784_v35 = vld [vmem:[%s3959_s10 + $0x38] sm:$0xff] }
0x11ef   :  { %3085 = vmatprep.mubr.msk.f32.mxu1 %vm3329_vm9, %v3328_v13 }
0x11f1   :  { %v1931_v36 = vpop.permute.xlu1 %1930 }
0x11f2   :  { %3084 = vmatpush3.xpose.msk.msra.mxu1 %vm446_vm10, %v1931_v36 }
0x11f3   :  { %3093 = vmatprep.subr.mxu1 %v3328_v13 }
0x11f5   :  { %3086 = vmatmul.mubr.msk.f32.vlgmr.msra.gmra.mrb[20].mxu1 %vm446_vm10, %v3761_v9  ;;  %v2097_v38 = vpop.permute.xlu1 %2096 }
0x11f6   :  { %3094 = vmatpush3.xpose.msk.msra.mxu1 %vm446_vm10, %v2099_v37  ;;  %3095 = vmatprep.mubr.msk.f32.mxu1 %vm3329_vm9, %v3328_v13  ;;  %v3231_v37 = vpack.c.bf16 %v2784_v35, %v2783_v34  ;;  %v2808_v35 = vld [vmem:[%s3966_s17 + $0x1] ss:$0 sm:$0xff] }
0x11f9   :  { %3096 = vmatmul.mubr.msk.f32.vlgmr.msra.gmra.mrb[22].mxu1 %vm446_vm10, %v2097_v38 }
0x11fa   :  { %3111 = vmatprep.mubr.msk.f32.mxu1 %vm3329_vm9, %v3328_v13 }
0x12c0   :  { %v1667_v39 = vpop.f32.mrb[10].mxu0 }
0x12c1   :  { %v1668_v40 = vadd.f32 %v1667_v39, %v3585_v22  ;;  %v3067_v41 = vpop.f32.mrb[11].mxu0  ;;  %v1833_v42 = vpop.f32.mrb[18].mxu1 }
0x12c2   :  { %v1834_v43 = vadd.f32 %v1833_v42, %v3585_v22  ;;  %v3077_v44 = vpop.f32.mrb[19].mxu1 }
0x12c3   :  { %v1672_v45 = vsel %vm1671_vm14, %v1668_v40, -inf }
0x12c4   :  { %1673 = vmax.xlane.f32.xlu0 %v1672_v45  ;;  %v1837_v46 = vsel %vm1671_vm14, %v1834_v43, -inf }
0x12c5   :  { %1838 = vmax.xlane.f32.xlu1 %v1837_v46 }
0x12c8   :  { %v2005_v48 = vpop.f32.mrb[20].mxu1 }
0x12c9   :  { %v2006_v49 = vadd.f32 %v2005_v48, %v1933_v47  ;;  %v3087_v50 = vpop.f32.mrb[21].mxu1 }
0x12cb   :  { %v2009_v51 = vsel %vm1671_vm14, %v2006_v49, -inf }
0x12cc   :  { %2010 = vmax.xlane.f32.xlu0 %v2009_v51  ;;  %v2170_v52 = vpop.f32.mrb[22].mxu1  ;;  %v2786_v51 = vld [vmem:[%s3960_s11 + $0x1] ss:$0 sm:$0xff] }
0x12cd   :  { %v2171_v53 = vadd.f32 %v2170_v52, %v1933_v47  ;;  %v3097_v54 = vpop.f32.mrb[23].mxu1 }
0x12cf   :  { %v2174_v55 = vsel %vm1671_vm14, %v2171_v53, -inf }
0x12d0   :  { %2175 = vmax.xlane.f32.xlu0 %v2174_v55 }
0x12d6   :  { %1683 = vrot.lane.b32.xlu1 %v3755_v32, %s3333_s2 }
0x1351   :  { %v1674_v56 = vpop.xlane.xlu0 %1673 }
0x1352   :  { %v1675_v57 = vsub.f32 %v1668_v40, %v1674_v56  ;;  %v1839_v58 = vpop.xlane.xlu1 %1838 }
0x1353   :  { %v1840_v11 = vsub.f32 %v1834_v43, %v1839_v58 }
0x1354   :  { %v1676_v22 = vmul.f32 1.442695, %v1675_v57 }
0x1355   :  { %v1841_v8 = vmul.f32 1.442695, %v1840_v11 }
0x1356   :  { %3303 = vpow2.f32 %v1676_v22  ;;  %v1684_v59 = vpop.permute.xlu1 %1683 }
0x1357   :  { %3305 = vpow2.f32 %v1841_v8  ;;  %3069 = vmatpush3.msra.mxu0 %v1684_v59  ;;  %v2792_v59 = vld [vmem:[%s3961_s14 + $0x20] sm:$0xff] }
0x1358   :  { %3078 = vmatprep.subr.mxu0 %v3328_v13 }
0x1359   :  { %v2011_v60 = vpop.xlane.xlu0 %2010 }
0x135a   :  { %v2012_v61 = vsub.f32 %v2006_v49, %v2011_v60  ;;  %v2793_v60 = vld [vmem:[%s3961_s14 + $0x28] sm:$0xff] }
0x135c   :  { %v2013_v62 = vmul.f32 1.442695, %v2012_v61  ;;  %v3234_v61 = vpack.c.bf16 %v2793_v60, %v2792_v59 }
0x135d   :  { %v2176_v63 = vpop.xlane.xlu0 %2175 }
0x135e   :  { %3307 = vpow2.f32 %v2013_v62  ;;  %v2177_v0 = vsub.f32 %v2171_v53, %v2176_v63  ;;  %v2795_v62 = vld [vmem:[%s3961_s14 + $0x38] sm:$0xff] }
0x1360   :  { %v3304_v1 = vpop.eup %3303  ;;  %v2178_v2 = vmul.f32 1.442695, %v2177_v0 }
0x1361   :  { %v3306_v3 = vpop.eup %3305  ;;  %v1678_v4 = vsel %vm1671_vm14, %v3304_v1, 0.0 }
0x1362   :  { %3309 = vpow2.f32 %v2178_v2  ;;  %1679 = vadd.xlane.f32.xlu1 %v1678_v4  ;;  %v1843_v5 = vsel %vm1671_vm14, %v3306_v3, 0.0  ;;  %v2790_v4 = vld [vmem:[%s3962_s12 + $0x1] ss:$0 sm:$0xff] }
0x1363   :  { %1844 = vadd.xlane.f32.xlu0 %v1843_v5 }
0x1368   :  { %v3308_v6 = vpop.eup %3307 }
0x1369   :  { %v2015_v7 = vsel %vm1671_vm14, %v3308_v6, 0.0 }
0x136a   :  { %2016 = vadd.xlane.f32.xlu1 %v2015_v7 }
0x136c   :  { %v3310_v10 = vpop.eup %3309 }
0x136d   :  { %v2180_v12 = vsel %vm1671_vm14, %v3310_v10, 0.0 }
0x136e   :  { %2181 = vadd.xlane.f32.xlu0 %v2180_v12  ;;  %v2799_v12 = vld [vmem:[%s3964_s16 + $0x40] sm:$0xff] }
0x137b   :  { %2020 = vrot.lane.b32.xlu1 %v3761_v9, %s3333_s2 }
0x137f   :  { %2185 = vrot.lane.b32.xlu1 %v3761_v9, %s3334_s7  ;;  %v3336_v9 = vmov 0.0|0.0  }
0x1380   :  { %3227 = vmatprep.subr.bf16.mxu1 %v3336_v9 }
0x1384   :  { %1848 = vrot.lane.b32.xlu0 %v3755_v32, %s3334_s7  ;;  %v2782_v32 = vld [vmem:[%s3959_s10 + $0x28] sm:$0xff] }
0x1385   :  { %v3228_v33 = vpack.c.bf16 %v2782_v32, %v2781_v31 }
0x1387   :  { %3229 = vmatpush3.bf16.msra.mxu1 %v3228_v33 }
0x1388   :  { %3230 = vmatprep.subr.bf16.mxu1 %v3336_v9 }
0x138b   :  { %3232 = vmatpush3.bf16.msra.mxu1 %v3231_v37 }
0x138c   :  { %3239 = vmatprep.subr.bf16.mxu1 %v3336_v9 }
0x13ef   :  { %v1680_v14 = vpop.xlane.xlu1 %1679 }
0x13f0   :  { %3311 = vrcp.f32 %v1680_v14  ;;  %v1845_v16 = vpop.xlane.xlu0 %1844  ;;  %v2800_v14 = vld [vmem:[%s3964_s16 + $0x48] sm:$0xff] }
0x13f1   :  { %3313 = vrcp.f32 %v1845_v16  ;;  %v3240_v16 = vpack.c.bf16 %v2800_v14, %v2799_v12 }
0x13f7   :  { %v2017_v17 = vpop.xlane.xlu1 %2016 }
0x13f8   :  { %3315 = vrcp.f32 %v2017_v17  ;;  %v2801_v17 = vld [vmem:[%s3964_s16 + $0x50] sm:$0xff] }
0x13fa   :  { %v3312_v18 = vpop.eup %3311 }
0x13fb   :  { %v1682_v19 = vmul.f32 %v3312_v18, %v3304_v1  ;;  %v2182_v20 = vpop.xlane.xlu0 %2181  ;;  %v3314_v21 = vpop.eup %3313 }
0x13fc   :  { %3317 = vrcp.f32 %v2182_v20  ;;  %v1847_v23 = vmul.f32 %v3314_v21, %v3306_v3  ;;  %v2021_v24 = vpop.permute.xlu1 %2020  ;;  %v2804_v20 = vld [vmem:[%s3964_s16 + $0x68] sm:$0xff] }
0x13fd   :  { %3071 = vmatmul.mubr.msk.f32.vlgmr.msra.gmra.mrb[12].mxu0 %vm521_vm11, %v1682_v19  ;;  %v2803_v19 = vld [vmem:[%s3964_s16 + $0x60] sm:$0xff] }
0x13fe   :  { %3080 = vmatprep.mubr.msk.f32.mxu0 %vm3329_vm9, %v3328_v13  ;;  %v3246_v21 = vpack.c.bf16 %v2804_v20, %v2803_v19 }
0x13ff   :  { %v1849_v25 = vpop.permute.xlu0 %1848 }
0x1400   :  { %3079 = vmatpush3.msra.mxu0 %v1849_v25  ;;  %v2186_v28 = vpop.permute.xlu1 %2185 }
0x1401   :  { %3081 = vmatmul.mubr.msk.f32.vlgmr.msra.gmra.mrb[14].mxu0 %vm521_vm11, %v1847_v23  ;;  %3088 = vmatprep.subr.mxu0 %v3328_v13  ;;  %v2805_v23 = vld [vmem:[%s3964_s16 + $0x70] sm:$0xff] }
0x1402   :  { %v3316_v26 = vpop.eup %3315  ;;  %3089 = vmatpush3.msra.mxu0 %v2021_v24  ;;  %3090 = vmatprep.mubr.msk.f32.mxu0 %vm3329_vm9, %v3328_v13  ;;  %v2806_v24 = vld [vmem:[%s3964_s16 + $0x78] sm:$0xff] }
0x1403   :  { %v2019_v27 = vmul.f32 %v3316_v26, %v3308_v6  ;;  %3098 = vmatprep.subr.mxu0 %v3328_v13  ;;  %v2791_v6 = vld [vmem:[%s3963_s13 + $0x1] ss:$0 sm:$0xff]  ;;  %v3249_v25 = vpack.c.bf16 %v2806_v24, %v2805_v23 }
0x1404   :  { %v2797_v26 = vld [vmem:[%s3965_s15 + $0x1] ss:$0 sm:$0xff] }
0x1405   :  { %3091 = vmatmul.mubr.msk.f32.vlgmr.msra.gmra.mrb[16].mxu0 %vm521_vm11, %v2019_v27 }
0x1406   :  { %v3318_v30 = vpop.eup %3317  ;;  %3099 = vmatpush3.msra.mxu0 %v2186_v28  ;;  %3100 = vmatprep.mubr.msk.f32.mxu0 %vm3329_vm9, %v3328_v13 }
0x1407   :  { %v2184_v15 = vmul.f32 %v3318_v30, %v3310_v10  ;;  %3233 = vmatprep.subr.bf16.mxu0 %v3336_v9 }
0x1409   :  { %3101 = vmatmul.mubr.msk.f32.vlgmr.msra.gmra.mrb[18].mxu0 %vm521_vm11, %v2184_v15 }
0x140a   :  { %3122 = vmatprep.mubr.msk.f32.mxu0 %vm3329_vm9, %v3328_v13  ;;  %3235 = vmatpush3.bf16.msra.mxu0 %v3234_v61 }
0x140b   :  { %3236 = vmatprep.subr.bf16.mxu0 %v3336_v9 }
0x14d0   :  { %v1755_v36 = vpop.f32.mrb[12].mxu0 }
0x14d1   :  { %v3072_v38 = vpop.f32.mrb[13].mxu0 }
0x14d4   :  { %v1920_v39 = vpop.f32.mrb[14].mxu0 }
0x14d5   :  { %1925 = vrot.lane.b32.xlu1 %v1920_v39, %s3335_s30  ;;  %v3082_v40 = vpop.f32.mrb[15].mxu0 }
0x14d8   :  { %v2092_v41 = vpop.f32.mrb[16].mxu0 }
0x14d9   :  { %v3092_v42 = vpop.f32.mrb[17].mxu0 }
0x14dc   :  { %v2257_v43 = vpop.f32.mrb[18].mxu0 }
0x14dd   :  { %2262 = vrot.lane.b32.xlu0 %v2257_v43, %s3335_s30  ;;  %v3102_v44 = vpop.f32.mrb[19].mxu0 }
0x1547   :  { %v1926_v45 = vpop.permute.xlu1 %1925 }
0x1548   :  { %v1928_v49 = vsel %vm446_vm10, %v1755_v36, %v1926_v45 }
0x154f   :  { %v2263_v46 = vpop.permute.xlu0 %2262 }
0x1550   :  { %v2265_v47 = vsel %vm446_vm10, %v2092_v41, %v2263_v46  ;;  %v2606_v46 = vld [vmem:[%s3969_s20] sm:$0xff] }
0x1551   :  { %v2267_v48 = vrot.slane %v2265_v47, 7  ;;  %v2607_v47 = vld [vmem:[%s3969_s20 + $0x8] sm:$0xff] }
0x1553   :  { %v2270_v50 = vsel %vm2269_vm13, %v1928_v49, %v2267_v48  ;;  %v3252_v48 = vpack.c.bf16 %v2607_v47, %v2606_v46  ;;  %v2608_v49 = vld [vmem:[%s3969_s20 + $0x10] sm:$0xff] }
0x1554   :  { %3112 = vmatmul.mubr.msk.f32.vlgmr.msra.gmra.mrb[24].mxu1 %vm303_vm8, %v2270_v50  ;;  %v2609_v50 = vld [vmem:[%s3969_s20 + $0x18] sm:$0xff] }
0x1555   :  { %3141 = vmatprep.mubr.msk.f32.mxu1 %vm3329_vm9, %v3328_v13  ;;  %3241 = vmatpush3.bf16.msra.mxu1 %v3240_v16 }
0x1556   :  { %3242 = vmatprep.subr.bf16.mxu1 %v3336_v9 }
0x1627   :  { %v2356_v52 = vpop.f32.mrb[24].mxu1 }
0x1628   :  { %v2357_v53 = vadd.f32 %v2786_v51, %v2356_v52  ;;  %v3113_v54 = vpop.f32.mrb[25].mxu1  ;;  %v3255_v51 = vpack.c.bf16 %v2609_v50, %v2608_v49 }
0x162a   :  { %v2360_v55 = vadd.f32 %v2357_v53, %v3748_v29  ;;  %v2794_v29 = vld [vmem:[%s3961_s14 + $0x30] sm:$0xff] }
0x162b   :  { %v3237_v63 = vpack.c.bf16 %v2795_v62, %v2794_v29  ;;  %v2816_v29 = vld [vmem:[%s3972_s22] ss:$0 sm:$0xff] }
0x162c   :  { %v2366_v56 = vsel %vm2365_vm15, %v2360_v55, 0.0 }
0x162d   :  { %2367 = vadd.xlane.f32.xlu0 %v2366_v56  ;;  %3238 = vmatpush3.bf16.msra.mxu0 %v3237_v63  ;;  %v2812_v56 = vld [vmem:[%s3967_s18 + $0x1] ss:$0 sm:$0xff] }
0x162e   :  { %3251 = vmatprep.subr.bf16.mxu0 %v3336_v9 }
0x16ba   :  { %v2368_v57 = vpop.xlane.xlu0 %2367 }
0x16bb   :  { %v2369_v58 = vmul.f32 0.03125, %v2368_v57 }
0x16bd   :  { %v2370_v11 = vsub.f32 %v2360_v55, %v2369_v58  ;;  %v2813_v58 = vld [vmem:[%s3968_s19 + $0x1] ss:$0 sm:$0xff] }
0x16bf   :  { %v2371_v22 = vmul.f32 %v2370_v11, %v2370_v11 }
0x16c1   :  { %v2372_v8 = vsel %vm2365_vm15, %v2371_v22, 0.0 }
0x16c2   :  { %2373 = vadd.xlane.f32.xlu1 %v2372_v8  ;;  %v2814_v8 = vld [vmem:[%s3971_s21] ss:$0 sm:$0xff] }
0x174f   :  { %v2374_v0 = vpop.xlane.xlu1 %2373 }
0x1750   :  { %v2375_v1 = vmul.f32 0.03125, %v2374_v0 }
0x1752   :  { %v2376_v2 = vadd.f32 1e-12, %v2375_v1 }
0x1754   :  { %3319 = vrsqrt.f32 %v2376_v2 }
0x175e   :  { %v3320_v3 = vpop.eup %3319 }
0x175f   :  { %v2378_v5 = vmul.f32 %v3320_v3, %v2370_v11 }
0x1761   :  { %v2385_v7 = vmul.f32 %v2790_v4, %v2378_v5 }
0x1763   :  { %v2392_v10 = vadd.f32 %v2791_v6, %v2385_v7 }
0x1765   :  { %3123 = vmatmul.mubr.msk.f32.vlgmr.msra.gmra.mrb[20].mxu0 %vm303_vm8, %v2392_v10 }
0x1766   :  { %3152 = vmatprep.mubr.msk.f32.mxu0 %vm3329_vm9, %v3328_v13  ;;  %v2802_v13 = vld [vmem:[%s3964_s16 + $0x58] sm:$0xff]  ;;  %3253 = vmatpush3.bf16.msra.mxu0 %v3252_v48 }
0x1767   :  { %v3243_v18 = vpack.c.bf16 %v2802_v13, %v2801_v17  ;;  %3254 = vmatprep.subr.bf16.mxu0 %v3336_v9 }
0x1769   :  { %3244 = vmatpush3.bf16.msra.mxu1 %v3243_v18 }
0x176a   :  { %3245 = vmatprep.subr.bf16.mxu1 %v3336_v9  ;;  %3256 = vmatpush3.bf16.msra.mxu0 %v3255_v51 }
0x176d   :  { %3247 = vmatpush3.bf16.msra.mxu1 %v3246_v21 }
0x176e   :  { %3248 = vmatprep.subr.bf16.mxu1 %v3336_v9  ;;  %v29_v9 = vstv %s3970_s23 }
0x176f   :  { %30 = vst [vmem:[#allocation2] sm:$0x1] %v29_v9 }
0x1771   :  { %3250 = vmatpush3.bf16.msra.mxu1 %v3249_v25 }
0x1776   :  { %v2817_v1 = vld [vmem:[#allocation2] ss:$0 sm:$0xff] }
0x1838   :  { %v2475_v27 = vpop.f32.mrb[20].mxu0 }
0x1839   :  { %v2476_v28 = vadd.f32 %v2797_v26, %v2475_v27  ;;  %v3124_v30 = vpop.f32.mrb[21].mxu0 }
0x183b   :  { %v2480_v15 = vmul.f32 0.70710677, %v2476_v28  ;;  %v2479_v32 = vmul.f32 0.5, %v2476_v28 }
0x183d   :  { %3321 = verf.f32 %v2480_v15 }
0x1847   :  { %v3322_v31 = vpop.eup %3321 }
0x1848   :  { %v2482_v33 = vadd.f32 1.0, %v3322_v31 }
0x184a   :  { %v2483_v34 = vmul.f32 %v2482_v33, %v2479_v32 }
0x184c   :  { %3142 = vmatmul.mubr.msk.f32.vlgmr.msra.gmra.mrb[26].mxu1 %vm1372_vm12, %v2483_v34 }
0x191f   :  { %v2570_v36 = vpop.f32.mrb[26].mxu1 }
0x1920   :  { %v2571_v37 = vadd.f32 %v2808_v35, %v2570_v36  ;;  %v3143_v38 = vpop.f32.mrb[27].mxu1 }
0x1922   :  { %v2574_v39 = vadd.f32 %v2571_v37, %v2392_v10 }
0x1924   :  { %v2579_v40 = vsel %vm2365_vm15, %v2574_v39, 0.0 }
0x1925   :  { %2580 = vadd.xlane.f32.xlu0 %v2579_v40 }
0x19b2   :  { %v2581_v41 = vpop.xlane.xlu0 %2580 }
0x19b3   :  { %v2582_v42 = vmul.f32 0.03125, %v2581_v41 }
0x19b5   :  { %v2583_v43 = vsub.f32 %v2574_v39, %v2582_v42 }
0x19b7   :  { %v2584_v44 = vmul.f32 %v2583_v43, %v2583_v43 }
0x19b9   :  { %v2585_v45 = vsel %vm2365_vm15, %v2584_v44, 0.0 }
0x19ba   :  { %2586 = vadd.xlane.f32.xlu0 %v2585_v45 }
0x1a47   :  { %v2587_v52 = vpop.xlane.xlu0 %2586 }
0x1a48   :  { %v2588_v53 = vmul.f32 0.03125, %v2587_v52 }
0x1a4a   :  { %v2589_v54 = vadd.f32 1e-12, %v2588_v53 }
0x1a4c   :  { %3323 = vrsqrt.f32 %v2589_v54 }
0x1a56   :  { %v3324_v55 = vpop.eup %3323 }
0x1a57   :  { %v2591_v57 = vmul.f32 %v3324_v55, %v2583_v43 }
0x1a59   :  { %v2598_v11 = vmul.f32 %v2812_v56, %v2591_v57 }
0x1a5b   :  { %v2605_v22 = vadd.f32 %v2813_v58, %v2598_v11 }
0x1a5d   :  { %3153 = vmatmul.mubr.msk.f32.vlgmr.msra.gmra.mrb[22].mxu0 %vm303_vm8, %v2605_v22 }
0x1b30   :  { %v2686_v59 = vpop.f32.mrb[22].mxu0 }
0x1b31   :  { %v2687_v60 = vadd.f32 %v2814_v8, %v2686_v59  ;;  %v3154_v61 = vpop.f32.mrb[23].mxu0 }
0x1b33   :  { %3325 = vtanh.f32 %v2687_v60 }
0x1b3d   :  { %v3326_v62 = vpop.eup %3325 }
0x1b3e   :  { %v2698_v63 = vmul.f32 %v3326_v62, %v2816_v29 }
0x1b40   :  { %v2699_v0 = vsel %vm2365_vm15, %v2698_v63, 0.0 }
0x1b41   :  { %2700 = vadd.xlane.f32.xlu1 %v2699_v0 }
0x1bce   :  { %v2701_v2 = vpop.xlane.xlu1 %2700 }
0x1bcf   :  { %v2709_v3 = vadd.f32 %v2817_v1, %v2701_v2 }
0x1bd1   :  { %2712 = vperm.xlu0 %3269, %v2709_v3  }
0x1c50   :  { %v2713_v4 = vpop.permute.xlu0 %2712 }
0x1c51   :  { %v2715_v5 = vsel %vm130_vm0, %v2713_v4, 0.0 }
0x1c52   :  { %2716 = vst [vmem:[%s3973_s24] sm:$0xff] %v2715_v5 }

</bundles_post_ra>
